<compile_context>
chip_gen: v7x
topology: tpu7x:2x2x1
jax: 0.10.0
libtpu: 0.0.40
codegen_flags: <defaults>
</compile_context>

<pallas_src>
import functools

import numpy as np
import jax
import jax.numpy as jnp
from jax import lax
from jax.experimental import pallas as pl
from jax.experimental.pallas import tpu as pltpu

LANE = 128  # TPU lane width; feature / gate blocks are padded to this


def _round_up(x, m):
    return ((x + m - 1) // m) * m


# ----------------------------- Pallas kernel --------------------------------
def _attn_decoder_kernel(enc_ref, h0_ref, w_ctx_ref, w_h_ref, b_ref,
                         w_out_ref, b_out_ref, out_ref,
                         enc_pad_ref, hpad_ref, *, out_len):
    S, H = enc_ref.shape                 # raw encoder outputs (S, H)
    HP = w_ctx_ref.shape[0]              # padded hidden width (multiple of 128)
    HP3 = 3 * HP

    # ---- prologue: zero-pad activations to lane width inside VMEM ----------
    enc_pad_ref[...] = jnp.zeros_like(enc_pad_ref)
    enc_pad_ref[:, :H] = enc_ref[...]
    hpad_ref[...] = jnp.zeros_like(hpad_ref)
    hpad_ref[:, :H] = h0_ref[...]

    enc = enc_pad_ref[...]               # (S, HP)  f32, padded lanes are zero
    h = hpad_ref[...]                    # (1, HP)  f32, padded lanes are zero

    # loop-invariant encoder row norms, hoisted out of the recurrence (EUP)
    # (zero-norm rows -> inf, matching the reference's divide-by-zero)
    inv_en = lax.rsqrt(jnp.sum(enc * enc, axis=-1, keepdims=True))   # (S, 1)

    w_ctx = w_ctx_ref[...]               # (HP, 3HP) bf16: context -> gi
    w_h = w_h_ref[...]                   # (HP, 6HP) bf16: h -> [gi(dec_in) | gh]
    b = b_ref[...]                       # (1, 6HP)  f32
    b_gi = b[:, :HP3]
    b_gh = b[:, HP3:]

    # out_len is a small static constant -> full compile-time unroll
    # (straight-line code; no per-iteration loop/branch overhead).
    for step in range(out_len):
        # ---- cosine-similarity attention (VPU/XLU + EUP, all f32) ----------
        inv_h = lax.rsqrt(jnp.sum(h * h, axis=-1, keepdims=True))      # (1, 1)
        dots = jnp.sum(enc * h, axis=-1, keepdims=True)                # (S, 1)
        scores = dots * inv_en * inv_h                                 # (S, 1)
        context = jnp.sum(scores * enc, axis=0, keepdims=True)         # (1, HP)

        # ---- GRU cell: bf16 MXU operands, f32 accumulation & gates ---------
        g_ctx = jnp.dot(context.astype(jnp.bfloat16), w_ctx,
                        preferred_element_type=jnp.float32)            # (1, 3HP)
        h_bf = h.astype(jnp.bfloat16)
        if step == 0:
            # decoder_input == 0: no gi contribution from the recurrent input.
            gi = g_ctx + b_gi
            gh = jnp.dot(h_bf, w_h[:, HP3:],
                         preferred_element_type=jnp.float32) + b_gh
        else:
            # decoder_input == h: one fused matmul gives both gi and gh parts.
            g_h = jnp.dot(h_bf, w_h, preferred_element_type=jnp.float32)  # (1, 6HP)
            gi = g_ctx + g_h[:, :HP3] + b_gi
            gh = g_h[:, HP3:] + b_gh

        r = jax.nn.sigmoid(gi[:, 0 * HP:1 * HP] + gh[:, 0 * HP:1 * HP])
        z = jax.nn.sigmoid(gi[:, 1 * HP:2 * HP] + gh[:, 1 * HP:2 * HP])
        n = jnp.tanh(gi[:, 2 * HP:3 * HP] + r * gh[:, 2 * HP:3 * HP])
        # padded lanes: gi=gh=0 -> r=z=0.5, n=0, and h_pad=0 stays 0 forever.
        h = (1.0 - z) * n + z * h

    # final Linear (`self.out`); lane-dense (1, 128) store; dropout == identity.
    out_ref[...] = (jnp.dot(h.astype(jnp.bfloat16), w_out_ref[...],
                            preferred_element_type=jnp.float32) + b_out_ref[...])


# --------------------- one-time parameter repacking ---------------------------
def pack_params(params):
    """Repack PyTorch-layout GRU / Linear weights into the split, 128-lane-aligned
    bf16 layout the kernel consumes.  Done ONCE at parameter-load time."""
    w_ih = np.asarray(params["w_ih"], np.float32)     # (3H, 2H), rows = [r; z; n]
    w_hh = np.asarray(params["w_hh"], np.float32)     # (3H, H)
    b_ih = np.asarray(params["b_ih"], np.float32)     # (3H,)
    b_hh = np.asarray(params["b_hh"], np.float32)     # (3H,)
    w_out = np.asarray(params["w_out"], np.float32)   # (O, H)
    b_out = np.asarray(params["b_out"], np.float32)   # (O,)

    H = w_hh.shape[1]
    O = w_out.shape[0]
    HP = _round_up(H, LANE)
    OP = _round_up(O, LANE)

    # gates = [gi_r | gi_z | gi_n | gh_r | gh_z | gh_n] at col offsets g*HP
    w_ctx = np.zeros((HP, 3 * HP), np.float32)        # context rows -> gi cols
    w_h = np.zeros((HP, 6 * HP), np.float32)          # h rows -> [gi(dec_in)|gh]
    b = np.zeros((1, 6 * HP), np.float32)
    for g in range(3):                                 # gate order r, z, n
        rows = slice(g * H, (g + 1) * H)
        w_ctx[:H, g * HP:g * HP + H] = w_ih[rows, :H].T          # context part
        w_h[:H, g * HP:g * HP + H] = w_ih[rows, H:2 * H].T       # dec_in part
        w_h[:H, (3 + g) * HP:(3 + g) * HP + H] = w_hh[rows, :].T
        b[0, g * HP:g * HP + H] = b_ih[rows]
        b[0, (3 + g) * HP:(3 + g) * HP + H] = b_hh[rows]

    w_out_pad = np.zeros((HP, OP), np.float32)
    w_out_pad[:H, :O] = w_out.T
    b_out_pad = np.zeros((1, OP), np.float32)
    b_out_pad[0, :O] = b_out

    # matmul operands in bf16 (MXU default precision truncates anyway);
    # biases stay f32 (added post-matmul; v5e VPU has no bf16).
    return dict(
        w_ctx=jnp.asarray(w_ctx, jnp.bfloat16),
        w_h=jnp.asarray(w_h, jnp.bfloat16),
        b=jnp.asarray(b),
        w_out=jnp.asarray(w_out_pad, jnp.bfloat16),
        b_out=jnp.asarray(b_out_pad),
    )


# ------------------------------- wrapper -------------------------------------
@functools.partial(jax.jit, static_argnums=(3, 4))
def attention_decoder_forward(packed, encoder_output, encoder_hidden,
                              out_len, output_size):
    """encoder_output: (S, 1, H), encoder_hidden: (1, 1, H)  ->  (1, 1, O)."""
    S, _, H = encoder_output.shape
    HP = packed["w_ctx"].shape[0]
    OP = packed["w_out"].shape[1]

    # raw activations only (reshape is metadata); all padding / normalization
    # happens inside the kernel so there is no padded HBM round trip.
    enc = encoder_output.reshape(S, H).astype(jnp.float32)
    h0 = encoder_hidden.reshape(1, H).astype(jnp.float32)

    kernel = functools.partial(_attn_decoder_kernel, out_len=out_len)
    vmem = pl.BlockSpec(memory_space=pltpu.MemorySpace.VMEM)

    # advisory cost estimate: latency-bound microkernel, tell XLA it is cheap
    flops = out_len * (2 * HP * 3 * HP + 2 * HP * 6 * HP + 6 * S * HP) + 2 * HP * OP
    transcendentals = out_len * (3 * HP + S + 1)
    bytes_accessed = (enc.size + h0.size) * 4 \
        + (packed["w_ctx"].size + packed["w_h"].size + packed["w_out"].size) * 2 \
        + (packed["b"].size + packed["b_out"].size) * 4 + OP * 4

    out = pl.pallas_call(
        kernel,
        out_shape=jax.ShapeDtypeStruct((1, OP), jnp.float32),
        in_specs=[vmem] * 7,
        out_specs=vmem,
        scratch_shapes=[pltpu.VMEM((S, HP), jnp.float32),   # padded encoder outputs
                        pltpu.VMEM((1, HP), jnp.float32)],  # padded initial hidden
        cost_estimate=pl.CostEstimate(flops=flops,
                                      transcendentals=transcendentals,
                                      bytes_accessed=bytes_accessed),
    )(enc, h0, packed["w_ctx"], packed["w_h"], packed["b"],
      packed["w_out"], packed["b_out"])
    return out[:, :output_size].reshape(1, 1, output_size)


# --------------------------- parameter init -----------------------------------
def init_params(key, hidden_size, output_size):
    H, O = hidden_size, output_size
    ks = jax.random.split(key, 6)
    bound = 1.0 / np.sqrt(H)
    u = lambda k, shp: jax.random.uniform(k, shp, jnp.float32, -bound, bound)
    # Note: BahadanauAttention.Wa/Ua/Va are never used in forward -> omitted.
    return dict(
        w_ih=u(ks[0], (3 * H, 2 * H)),   # GRU weight_ih_l0
        w_hh=u(ks[1], (3 * H, H)),       # GRU weight_hh_l0
        b_ih=u(ks[2], (3 * H,)),
        b_hh=u(ks[3], (3 * H,)),
        w_out=u(ks[4], (O, H)),          # nn.Linear(H, O)
        b_out=u(ks[5], (O,)),
    )


# ----------------------- pure-numpy reference (PyTorch semantics) -------------
def reference_forward(params, encoder_output, encoder_hidden, out_len):
    def sigmoid(x):
        return 1.0 / (1.0 + np.exp(-x))

    enc = np.asarray(encoder_output, np.float32)
    S, H = enc.shape[0], enc.shape[-1]
    enc = enc.reshape(S, H)
    h = np.asarray(encoder_hidden, np.float32).reshape(1, H)
    dec_in = np.zeros((1, H), np.float32)

    w_ih = np.asarray(params["w_ih"]); w_hh = np.asarray(params["w_hh"])
    b_ih = np.asarray(params["b_ih"]); b_hh = np.asarray(params["b_hh"])
    w_out = np.asarray(params["w_out"]); b_out = np.asarray(params["b_out"])

    for _ in range(out_len):
        hv = h.reshape(-1)
        cos = np.array([hv @ enc[i] / (np.linalg.norm(hv) * np.linalg.norm(enc[i]))
                        for i in range(S)], np.float32)
        context = np.sum(cos[:, None] * enc, axis=0, keepdims=True)    # (1, H)
        x = np.concatenate([context, dec_in], axis=-1)                 # (1, 2H)
        gi = x @ w_ih.T + b_ih
        gh = h @ w_hh.T + b_hh
        r = sigmoid(gi[:, :H] + gh[:, :H])
        z = sigmoid(gi[:, H:2 * H] + gh[:, H:2 * H])
        n = np.tanh(gi[:, 2 * H:] + r * gh[:, 2 * H:])
        h = (1.0 - z) * n + z * h
        dec_in = h
    out = h @ w_out.T + b_out
    return out.reshape(1, 1, -1)


# ----------------------------------- main --------------------------------------
if __name__ == "__main__":
    hidden_size = 32
    output_size = 32
    seq_len = 8
    out_len = 6

    key = jax.random.PRNGKey(0)
    k_par, k_enc, k_hid = jax.random.split(key, 3)

    params = init_params(k_par, hidden_size, output_size)
    packed = pack_params(params)     # one-time weight repacking (not per call)

    # PyTorch-style shapes: encoder_output (S, 1, H), encoder_hidden (1, 1, H)
    encoder_output = jax.random.normal(k_enc, (seq_len, 1, hidden_size), jnp.float32)
    encoder_hidden = jax.random.normal(k_hid, (1, 1, hidden_size), jnp.float32)

    out = attention_decoder_forward(packed, encoder_output, encoder_hidden,
                                    out_len, output_size)
    out = jax.block_until_ready(out)

    ref = reference_forward(params, encoder_output, encoder_hidden, out_len)
    # Tolerance accounts for bf16 matmul operands (same rounding as the default
    # MXU precision path) compounded over the 6-step recurrence.
    np.testing.assert_allclose(np.asarray(out), ref, rtol=1e-2, atol=1e-2)

    print("KERNEL_OK")
</pallas_src>

<mosaic_0001>
module attributes {stable_mosaic.version = 11 : i64} {
  func.func @_attn_decoder_kernel(%arg0: memref<8x32xf32, #tpu.memory_space<vmem>>, %arg1: memref<1x32xf32, #tpu.memory_space<vmem>>, %arg2: memref<128x384xbf16, #tpu.memory_space<vmem>>, %arg3: memref<128x768xbf16, #tpu.memory_space<vmem>>, %arg4: memref<1x768xf32, #tpu.memory_space<vmem>>, %arg5: memref<128x128xbf16, #tpu.memory_space<vmem>>, %arg6: memref<1x128xf32, #tpu.memory_space<vmem>>, %arg7: memref<1x128xf32, #tpu.memory_space<vmem>>, %arg8: memref<8x128xf32, #tpu.memory_space<vmem>>, %arg9: memref<1x128xf32, #tpu.memory_space<vmem>>) attributes {dimension_semantics = [], scalar_prefetch = 0 : i64, scratch_operands = 2 : i64, tpu.core_type = #tpu.core_type<tc>} {
    %cst = arith.constant 0.000000e+00 : f32
    %0 = vector.broadcast %cst : f32 to vector<8x128xf32>
    %c0 = arith.constant 0 : index
    %c0_0 = arith.constant 0 : index
    %1 = vector.load %arg8[%c0, %c0_0] : memref<8x128xf32, #tpu.memory_space<vmem>>, vector<8x128xf32>
    tpu.vector_store %arg8[%c0, %c0_0], %0 {strides = array<i32>} : memref<8x128xf32, #tpu.memory_space<vmem>>, vector<8x128xf32>,
    %c0_1 = arith.constant 0 : index
    %c0_2 = arith.constant 0 : index
    %2 = vector.load %arg0[%c0_1, %c0_2] : memref<8x32xf32, #tpu.memory_space<vmem>>, vector<8x32xf32>
    %c0_3 = arith.constant 0 : index
    %c0_4 = arith.constant 0 : index
    %3 = vector.load %arg8[%c0_3, %c0_4] : memref<8x128xf32, #tpu.memory_space<vmem>>, vector<8x32xf32>
    tpu.vector_store %arg8[%c0_3, %c0_4], %2 {strides = array<i32>} : memref<8x128xf32, #tpu.memory_space<vmem>>, vector<8x32xf32>,
    %cst_5 = arith.constant 0.000000e+00 : f32
    %4 = vector.broadcast %cst_5 : f32 to vector<1x128xf32>
    %c0_6 = arith.constant 0 : index
    %c0_7 = arith.constant 0 : index
    %5 = vector.load %arg9[%c0_6, %c0_7] : memref<1x128xf32, #tpu.memory_space<vmem>>, vector<1x128xf32>
    tpu.vector_store %arg9[%c0_6, %c0_7], %4 {strides = array<i32>} : memref<1x128xf32, #tpu.memory_space<vmem>>, vector<1x128xf32>,
    %c0_8 = arith.constant 0 : index
    %c0_9 = arith.constant 0 : index
    %6 = vector.load %arg1[%c0_8, %c0_9] : memref<1x32xf32, #tpu.memory_space<vmem>>, vector<1x32xf32>
    %c0_10 = arith.constant 0 : index
    %c0_11 = arith.constant 0 : index
    %7 = vector.load %arg9[%c0_10, %c0_11] : memref<1x128xf32, #tpu.memory_space<vmem>>, vector<1x32xf32>
    tpu.vector_store %arg9[%c0_10, %c0_11], %6 {strides = array<i32>} : memref<1x128xf32, #tpu.memory_space<vmem>>, vector<1x32xf32>,
    %c0_12 = arith.constant 0 : index
    %c0_13 = arith.constant 0 : index
    %8 = vector.load %arg8[%c0_12, %c0_13] : memref<8x128xf32, #tpu.memory_space<vmem>>, vector<8x128xf32>
    %c0_14 = arith.constant 0 : index
    %c0_15 = arith.constant 0 : index
    %9 = vector.load %arg9[%c0_14, %c0_15] : memref<1x128xf32, #tpu.memory_space<vmem>>, vector<1x128xf32>
    %10 = arith.mulf %8, %8 : vector<8x128xf32>
    %cst_16 = arith.constant dense<0.000000e+00> : vector<8xf32>
    %11 = vector.multi_reduction <add>, %10, %cst_16 [1] : vector<8x128xf32> to vector<8xf32>
    %12 = vector.shape_cast %11 : vector<8xf32> to vector<8x1xf32>
    %13 = math.rsqrt %12 : vector<8x1xf32>
    %c0_17 = arith.constant 0 : index
    %c0_18 = arith.constant 0 : index
    %14 = vector.load %arg2[%c0_17, %c0_18] : memref<128x384xbf16, #tpu.memory_space<vmem>>, vector<128x384xbf16>
    %c0_19 = arith.constant 0 : index
    %c0_20 = arith.constant 0 : index
    %15 = vector.load %arg3[%c0_19, %c0_20] : memref<128x768xbf16, #tpu.memory_space<vmem>>, vector<128x768xbf16>
    %c0_21 = arith.constant 0 : index
    %c0_22 = arith.constant 0 : index
    %16 = vector.load %arg4[%c0_21, %c0_22] : memref<1x768xf32, #tpu.memory_space<vmem>>, vector<1x768xf32>
    %17 = vector.extract_strided_slice %16 {offsets = [0, 0], sizes = [1, 384], strides = [1, 1]} : vector<1x768xf32> to vector<1x384xf32>
    %18 = vector.extract_strided_slice %16 {offsets = [0, 384], sizes = [1, 384], strides = [1, 1]} : vector<1x768xf32> to vector<1x384xf32>
    %19 = arith.mulf %9, %9 : vector<1x128xf32>
    %cst_23 = arith.constant dense<0.000000e+00> : vector<1xf32>
    %20 = vector.multi_reduction <add>, %19, %cst_23 [1] : vector<1x128xf32> to vector<1xf32>
    %21 = vector.shape_cast %20 : vector<1xf32> to vector<1x1xf32>
    %22 = math.rsqrt %21 : vector<1x1xf32>
    %23 = vector.broadcast %9 : vector<1x128xf32> to vector<8x128xf32>
    %24 = arith.mulf %8, %23 : vector<8x128xf32>
    %cst_24 = arith.constant dense<0.000000e+00> : vector<8xf32>
    %25 = vector.multi_reduction <add>, %24, %cst_24 [1] : vector<8x128xf32> to vector<8xf32>
    %26 = vector.shape_cast %25 : vector<8xf32> to vector<8x1xf32>
    %27 = arith.mulf %26, %13 : vector<8x1xf32>
    %28 = vector.broadcast %22 : vector<1x1xf32> to vector<8x1xf32>
    %29 = arith.mulf %27, %28 : vector<8x1xf32>
    %30 = vector.broadcast %29 : vector<8x1xf32> to vector<8x128xf32>
    %31 = arith.mulf %30, %8 : vector<8x128xf32>
    %cst_25 = arith.constant dense<0.000000e+00> : vector<128xf32>
    %32 = vector.multi_reduction <add>, %31, %cst_25 [0] : vector<8x128xf32> to vector<128xf32>
    %33 = vector.shape_cast %32 : vector<128xf32> to vector<1x128xf32>
    %34 = arith.truncf %33 : vector<1x128xf32> to vector<1x128xbf16>
    %cst_26 = arith.constant dense<0.000000e+00> : vector<1x384xf32>
    %35 = tpu.matmul %34, %14, %cst_26 {dimension_numbers = #tpu.dot_dimension_numbers<[1], [0], [0], [1], [0, 0, 1, 1], [], []>} : vector<1x128xbf16>, vector<128x384xbf16>, vector<1x384xf32> -> vector<1x384xf32>
    %36 = arith.truncf %9 : vector<1x128xf32> to vector<1x128xbf16>
    %37 = arith.addf %35, %17 : vector<1x384xf32>
    %38 = vector.extract_strided_slice %15 {offsets = [0, 384], sizes = [128, 384], strides = [1, 1]} : vector<128x768xbf16> to vector<128x384xbf16>
    %cst_27 = arith.constant dense<0.000000e+00> : vector<1x384xf32>
    %39 = tpu.matmul %36, %38, %cst_27 {dimension_numbers = #tpu.dot_dimension_numbers<[1], [0], [0], [1], [0, 0, 1, 1], [], []>} : vector<1x128xbf16>, vector<128x384xbf16>, vector<1x384xf32> -> vector<1x384xf32>
    %40 = arith.addf %39, %18 : vector<1x384xf32>
    %41 = vector.extract_strided_slice %37 {offsets = [0, 0], sizes = [1, 128], strides = [1, 1]} : vector<1x384xf32> to vector<1x128xf32>
    %42 = vector.extract_strided_slice %40 {offsets = [0, 0], sizes = [1, 128], strides = [1, 1]} : vector<1x384xf32> to vector<1x128xf32>
    %43 = arith.addf %41, %42 : vector<1x128xf32>
    %44 = arith.negf %43 : vector<1x128xf32>
    %45 = math.exp %44 : vector<1x128xf32>
    %cst_28 = arith.constant 1.000000e+00 : f32
    %46 = vector.broadcast %cst_28 : f32 to vector<1x128xf32>
    %47 = arith.addf %46, %45 : vector<1x128xf32>
    %48 = arith.divf %46, %47 : vector<1x128xf32>
    %49 = vector.extract_strided_slice %37 {offsets = [0, 128], sizes = [1, 128], strides = [1, 1]} : vector<1x384xf32> to vector<1x128xf32>
    %50 = vector.extract_strided_slice %40 {offsets = [0, 128], sizes = [1, 128], strides = [1, 1]} : vector<1x384xf32> to vector<1x128xf32>
    %51 = arith.addf %49, %50 : vector<1x128xf32>
    %52 = arith.negf %51 : vector<1x128xf32>
    %53 = math.exp %52 : vector<1x128xf32>
    %cst_29 = arith.constant 1.000000e+00 : f32
    %54 = vector.broadcast %cst_29 : f32 to vector<1x128xf32>
    %55 = arith.addf %54, %53 : vector<1x128xf32>
    %56 = arith.divf %54, %55 : vector<1x128xf32>
    %57 = vector.extract_strided_slice %37 {offsets = [0, 256], sizes = [1, 128], strides = [1, 1]} : vector<1x384xf32> to vector<1x128xf32>
    %58 = vector.extract_strided_slice %40 {offsets = [0, 256], sizes = [1, 128], strides = [1, 1]} : vector<1x384xf32> to vector<1x128xf32>
    %59 = arith.mulf %48, %58 : vector<1x128xf32>
    %60 = arith.addf %57, %59 : vector<1x128xf32>
    %61 = math.tanh %60 : vector<1x128xf32>
    %cst_30 = arith.constant 1.000000e+00 : f32
    %62 = vector.broadcast %cst_30 : f32 to vector<1x128xf32>
    %63 = arith.subf %62, %56 : vector<1x128xf32>
    %64 = arith.mulf %63, %61 : vector<1x128xf32>
    %65 = arith.mulf %56, %9 : vector<1x128xf32>
    %66 = arith.addf %64, %65 : vector<1x128xf32>
    %67 = arith.mulf %66, %66 : vector<1x128xf32>
    %cst_31 = arith.constant dense<0.000000e+00> : vector<1xf32>
    %68 = vector.multi_reduction <add>, %67, %cst_31 [1] : vector<1x128xf32> to vector<1xf32>
    %69 = vector.shape_cast %68 : vector<1xf32> to vector<1x1xf32>
    %70 = math.rsqrt %69 : vector<1x1xf32>
    %71 = vector.broadcast %66 : vector<1x128xf32> to vector<8x128xf32>
    %72 = arith.mulf %8, %71 : vector<8x128xf32>
    %cst_32 = arith.constant dense<0.000000e+00> : vector<8xf32>
    %73 = vector.multi_reduction <add>, %72, %cst_32 [1] : vector<8x128xf32> to vector<8xf32>
    %74 = vector.shape_cast %73 : vector<8xf32> to vector<8x1xf32>
    %75 = arith.mulf %74, %13 : vector<8x1xf32>
    %76 = vector.broadcast %70 : vector<1x1xf32> to vector<8x1xf32>
    %77 = arith.mulf %75, %76 : vector<8x1xf32>
    %78 = vector.broadcast %77 : vector<8x1xf32> to vector<8x128xf32>
    %79 = arith.mulf %78, %8 : vector<8x128xf32>
    %cst_33 = arith.constant dense<0.000000e+00> : vector<128xf32>
    %80 = vector.multi_reduction <add>, %79, %cst_33 [0] : vector<8x128xf32> to vector<128xf32>
    %81 = vector.shape_cast %80 : vector<128xf32> to vector<1x128xf32>
    %82 = arith.truncf %81 : vector<1x128xf32> to vector<1x128xbf16>
    %cst_34 = arith.constant dense<0.000000e+00> : vector<1x384xf32>
    %83 = tpu.matmul %82, %14, %cst_34 {dimension_numbers = #tpu.dot_dimension_numbers<[1], [0], [0], [1], [0, 0, 1, 1], [], []>} : vector<1x128xbf16>, vector<128x384xbf16>, vector<1x384xf32> -> vector<1x384xf32>
    %84 = arith.truncf %66 : vector<1x128xf32> to vector<1x128xbf16>
    %cst_35 = arith.constant dense<0.000000e+00> : vector<1x768xf32>
    %85 = tpu.matmul %84, %15, %cst_35 {dimension_numbers = #tpu.dot_dimension_numbers<[1], [0], [0], [1], [0, 0, 1, 1], [], []>} : vector<1x128xbf16>, vector<128x768xbf16>, vector<1x768xf32> -> vector<1x768xf32>
    %86 = vector.extract_strided_slice %85 {offsets = [0, 0], sizes = [1, 384], strides = [1, 1]} : vector<1x768xf32> to vector<1x384xf32>
    %87 = arith.addf %83, %86 : vector<1x384xf32>
    %88 = arith.addf %87, %17 : vector<1x384xf32>
    %89 = vector.extract_strided_slice %85 {offsets = [0, 384], sizes = [1, 384], strides = [1, 1]} : vector<1x768xf32> to vector<1x384xf32>
    %90 = arith.addf %89, %18 : vector<1x384xf32>
    %91 = vector.extract_strided_slice %88 {offsets = [0, 0], sizes = [1, 128], strides = [1, 1]} : vector<1x384xf32> to vector<1x128xf32>
    %92 = vector.extract_strided_slice %90 {offsets = [0, 0], sizes = [1, 128], strides = [1, 1]} : vector<1x384xf32> to vector<1x128xf32>
    %93 = arith.addf %91, %92 : vector<1x128xf32>
    %94 = arith.negf %93 : vector<1x128xf32>
    %95 = math.exp %94 : vector<1x128xf32>
    %cst_36 = arith.constant 1.000000e+00 : f32
    %96 = vector.broadcast %cst_36 : f32 to vector<1x128xf32>
    %97 = arith.addf %96, %95 : vector<1x128xf32>
    %98 = arith.divf %96, %97 : vector<1x128xf32>
    %99 = vector.extract_strided_slice %88 {offsets = [0, 128], sizes = [1, 128], strides = [1, 1]} : vector<1x384xf32> to vector<1x128xf32>
    %100 = vector.extract_strided_slice %90 {offsets = [0, 128], sizes = [1, 128], strides = [1, 1]} : vector<1x384xf32> to vector<1x128xf32>
    %101 = arith.addf %99, %100 : vector<1x128xf32>
    %102 = arith.negf %101 : vector<1x128xf32>
    %103 = math.exp %102 : vector<1x128xf32>
    %cst_37 = arith.constant 1.000000e+00 : f32
    %104 = vector.broadcast %cst_37 : f32 to vector<1x128xf32>
    %105 = arith.addf %104, %103 : vector<1x128xf32>
    %106 = arith.divf %104, %105 : vector<1x128xf32>
    %107 = vector.extract_strided_slice %88 {offsets = [0, 256], sizes = [1, 128], strides = [1, 1]} : vector<1x384xf32> to vector<1x128xf32>
    %108 = vector.extract_strided_slice %90 {offsets = [0, 256], sizes = [1, 128], strides = [1, 1]} : vector<1x384xf32> to vector<1x128xf32>
    %109 = arith.mulf %98, %108 : vector<1x128xf32>
    %110 = arith.addf %107, %109 : vector<1x128xf32>
    %111 = math.tanh %110 : vector<1x128xf32>
    %cst_38 = arith.constant 1.000000e+00 : f32
    %112 = vector.broadcast %cst_38 : f32 to vector<1x128xf32>
    %113 = arith.subf %112, %106 : vector<1x128xf32>
    %114 = arith.mulf %113, %111 : vector<1x128xf32>
    %115 = arith.mulf %106, %66 : vector<1x128xf32>
    %116 = arith.addf %114, %115 : vector<1x128xf32>
    %117 = arith.mulf %116, %116 : vector<1x128xf32>
    %cst_39 = arith.constant dense<0.000000e+00> : vector<1xf32>
    %118 = vector.multi_reduction <add>, %117, %cst_39 [1] : vector<1x128xf32> to vector<1xf32>
    %119 = vector.shape_cast %118 : vector<1xf32> to vector<1x1xf32>
    %120 = math.rsqrt %119 : vector<1x1xf32>
    %121 = vector.broadcast %116 : vector<1x128xf32> to vector<8x128xf32>
    %122 = arith.mulf %8, %121 : vector<8x128xf32>
    %cst_40 = arith.constant dense<0.000000e+00> : vector<8xf32>
    %123 = vector.multi_reduction <add>, %122, %cst_40 [1] : vector<8x128xf32> to vector<8xf32>
    %124 = vector.shape_cast %123 : vector<8xf32> to vector<8x1xf32>
    %125 = arith.mulf %124, %13 : vector<8x1xf32>
    %126 = vector.broadcast %120 : vector<1x1xf32> to vector<8x1xf32>
    %127 = arith.mulf %125, %126 : vector<8x1xf32>
    %128 = vector.broadcast %127 : vector<8x1xf32> to vector<8x128xf32>
    %129 = arith.mulf %128, %8 : vector<8x128xf32>
    %cst_41 = arith.constant dense<0.000000e+00> : vector<128xf32>
    %130 = vector.multi_reduction <add>, %129, %cst_41 [0] : vector<8x128xf32> to vector<128xf32>
    %131 = vector.shape_cast %130 : vector<128xf32> to vector<1x128xf32>
    %132 = arith.truncf %131 : vector<1x128xf32> to vector<1x128xbf16>
    %cst_42 = arith.constant dense<0.000000e+00> : vector<1x384xf32>
    %133 = tpu.matmul %132, %14, %cst_42 {dimension_numbers = #tpu.dot_dimension_numbers<[1], [0], [0], [1], [0, 0, 1, 1], [], []>} : vector<1x128xbf16>, vector<128x384xbf16>, vector<1x384xf32> -> vector<1x384xf32>
    %134 = arith.truncf %116 : vector<1x128xf32> to vector<1x128xbf16>
    %cst_43 = arith.constant dense<0.000000e+00> : vector<1x768xf32>
    %135 = tpu.matmul %134, %15, %cst_43 {dimension_numbers = #tpu.dot_dimension_numbers<[1], [0], [0], [1], [0, 0, 1, 1], [], []>} : vector<1x128xbf16>, vector<128x768xbf16>, vector<1x768xf32> -> vector<1x768xf32>
    %136 = vector.extract_strided_slice %135 {offsets = [0, 0], sizes = [1, 384], strides = [1, 1]} : vector<1x768xf32> to vector<1x384xf32>
    %137 = arith.addf %133, %136 : vector<1x384xf32>
    %138 = arith.addf %137, %17 : vector<1x384xf32>
    %139 = vector.extract_strided_slice %135 {offsets = [0, 384], sizes = [1, 384], strides = [1, 1]} : vector<1x768xf32> to vector<1x384xf32>
    %140 = arith.addf %139, %18 : vector<1x384xf32>
    %141 = vector.extract_strided_slice %138 {offsets = [0, 0], sizes = [1, 128], strides = [1, 1]} : vector<1x384xf32> to vector<1x128xf32>
    %142 = vector.extract_strided_slice %140 {offsets = [0, 0], sizes = [1, 128], strides = [1, 1]} : vector<1x384xf32> to vector<1x128xf32>
    %143 = arith.addf %141, %142 : vector<1x128xf32>
    %144 = arith.negf %143 : vector<1x128xf32>
    %145 = math.exp %144 : vector<1x128xf32>
    %cst_44 = arith.constant 1.000000e+00 : f32
    %146 = vector.broadcast %cst_44 : f32 to vector<1x128xf32>
    %147 = arith.addf %146, %145 : vector<1x128xf32>
    %148 = arith.divf %146, %147 : vector<1x128xf32>
    %149 = vector.extract_strided_slice %138 {offsets = [0, 128], sizes = [1, 128], strides = [1, 1]} : vector<1x384xf32> to vector<1x128xf32>
    %150 = vector.extract_strided_slice %140 {offsets = [0, 128], sizes = [1, 128], strides = [1, 1]} : vector<1x384xf32> to vector<1x128xf32>
    %151 = arith.addf %149, %150 : vector<1x128xf32>
    %152 = arith.negf %151 : vector<1x128xf32>
    %153 = math.exp %152 : vector<1x128xf32>
    %cst_45 = arith.constant 1.000000e+00 : f32
    %154 = vector.broadcast %cst_45 : f32 to vector<1x128xf32>
    %155 = arith.addf %154, %153 : vector<1x128xf32>
    %156 = arith.divf %154, %155 : vector<1x128xf32>
    %157 = vector.extract_strided_slice %138 {offsets = [0, 256], sizes = [1, 128], strides = [1, 1]} : vector<1x384xf32> to vector<1x128xf32>
    %158 = vector.extract_strided_slice %140 {offsets = [0, 256], sizes = [1, 128], strides = [1, 1]} : vector<1x384xf32> to vector<1x128xf32>
    %159 = arith.mulf %148, %158 : vector<1x128xf32>
    %160 = arith.addf %157, %159 : vector<1x128xf32>
    %161 = math.tanh %160 : vector<1x128xf32>
    %cst_46 = arith.constant 1.000000e+00 : f32
    %162 = vector.broadcast %cst_46 : f32 to vector<1x128xf32>
    %163 = arith.subf %162, %156 : vector<1x128xf32>
    %164 = arith.mulf %163, %161 : vector<1x128xf32>
    %165 = arith.mulf %156, %116 : vector<1x128xf32>
    %166 = arith.addf %164, %165 : vector<1x128xf32>
    %167 = arith.mulf %166, %166 : vector<1x128xf32>
    %cst_47 = arith.constant dense<0.000000e+00> : vector<1xf32>
    %168 = vector.multi_reduction <add>, %167, %cst_47 [1] : vector<1x128xf32> to vector<1xf32>
    %169 = vector.shape_cast %168 : vector<1xf32> to vector<1x1xf32>
    %170 = math.rsqrt %169 : vector<1x1xf32>
    %171 = vector.broadcast %166 : vector<1x128xf32> to vector<8x128xf32>
    %172 = arith.mulf %8, %171 : vector<8x128xf32>
    %cst_48 = arith.constant dense<0.000000e+00> : vector<8xf32>
    %173 = vector.multi_reduction <add>, %172, %cst_48 [1] : vector<8x128xf32> to vector<8xf32>
    %174 = vector.shape_cast %173 : vector<8xf32> to vector<8x1xf32>
    %175 = arith.mulf %174, %13 : vector<8x1xf32>
    %176 = vector.broadcast %170 : vector<1x1xf32> to vector<8x1xf32>
    %177 = arith.mulf %175, %176 : vector<8x1xf32>
    %178 = vector.broadcast %177 : vector<8x1xf32> to vector<8x128xf32>
    %179 = arith.mulf %178, %8 : vector<8x128xf32>
    %cst_49 = arith.constant dense<0.000000e+00> : vector<128xf32>
    %180 = vector.multi_reduction <add>, %179, %cst_49 [0] : vector<8x128xf32> to vector<128xf32>
    %181 = vector.shape_cast %180 : vector<128xf32> to vector<1x128xf32>
    %182 = arith.truncf %181 : vector<1x128xf32> to vector<1x128xbf16>
    %cst_50 = arith.constant dense<0.000000e+00> : vector<1x384xf32>
    %183 = tpu.matmul %182, %14, %cst_50 {dimension_numbers = #tpu.dot_dimension_numbers<[1], [0], [0], [1], [0, 0, 1, 1], [], []>} : vector<1x128xbf16>, vector<128x384xbf16>, vector<1x384xf32> -> vector<1x384xf32>
    %184 = arith.truncf %166 : vector<1x128xf32> to vector<1x128xbf16>
    %cst_51 = arith.constant dense<0.000000e+00> : vector<1x768xf32>
    %185 = tpu.matmul %184, %15, %cst_51 {dimension_numbers = #tpu.dot_dimension_numbers<[1], [0], [0], [1], [0, 0, 1, 1], [], []>} : vector<1x128xbf16>, vector<128x768xbf16>, vector<1x768xf32> -> vector<1x768xf32>
    %186 = vector.extract_strided_slice %185 {offsets = [0, 0], sizes = [1, 384], strides = [1, 1]} : vector<1x768xf32> to vector<1x384xf32>
    %187 = arith.addf %183, %186 : vector<1x384xf32>
    %188 = arith.addf %187, %17 : vector<1x384xf32>
    %189 = vector.extract_strided_slice %185 {offsets = [0, 384], sizes = [1, 384], strides = [1, 1]} : vector<1x768xf32> to vector<1x384xf32>
    %190 = arith.addf %189, %18 : vector<1x384xf32>
    %191 = vector.extract_strided_slice %188 {offsets = [0, 0], sizes = [1, 128], strides = [1, 1]} : vector<1x384xf32> to vector<1x128xf32>
    %192 = vector.extract_strided_slice %190 {offsets = [0, 0], sizes = [1, 128], strides = [1, 1]} : vector<1x384xf32> to vector<1x128xf32>
    %193 = arith.addf %191, %192 : vector<1x128xf32>
    %194 = arith.negf %193 : vector<1x128xf32>
    %195 = math.exp %194 : vector<1x128xf32>
    %cst_52 = arith.constant 1.000000e+00 : f32
    %196 = vector.broadcast %cst_52 : f32 to vector<1x128xf32>
    %197 = arith.addf %196, %195 : vector<1x128xf32>
    %198 = arith.divf %196, %197 : vector<1x128xf32>
    %199 = vector.extract_strided_slice %188 {offsets = [0, 128], sizes = [1, 128], strides = [1, 1]} : vector<1x384xf32> to vector<1x128xf32>
    %200 = vector.extract_strided_slice %190 {offsets = [0, 128], sizes = [1, 128], strides = [1, 1]} : vector<1x384xf32> to vector<1x128xf32>
    %201 = arith.addf %199, %200 : vector<1x128xf32>
    %202 = arith.negf %201 : vector<1x128xf32>
    %203 = math.exp %202 : vector<1x128xf32>
    %cst_53 = arith.constant 1.000000e+00 : f32
    %204 = vector.broadcast %cst_53 : f32 to vector<1x128xf32>
    %205 = arith.addf %204, %203 : vector<1x128xf32>
    %206 = arith.divf %204, %205 : vector<1x128xf32>
    %207 = vector.extract_strided_slice %188 {offsets = [0, 256], sizes = [1, 128], strides = [1, 1]} : vector<1x384xf32> to vector<1x128xf32>
    %208 = vector.extract_strided_slice %190 {offsets = [0, 256], sizes = [1, 128], strides = [1, 1]} : vector<1x384xf32> to vector<1x128xf32>
    %209 = arith.mulf %198, %208 : vector<1x128xf32>
    %210 = arith.addf %207, %209 : vector<1x128xf32>
    %211 = math.tanh %210 : vector<1x128xf32>
    %cst_54 = arith.constant 1.000000e+00 : f32
    %212 = vector.broadcast %cst_54 : f32 to vector<1x128xf32>
    %213 = arith.subf %212, %206 : vector<1x128xf32>
    %214 = arith.mulf %213, %211 : vector<1x128xf32>
    %215 = arith.mulf %206, %166 : vector<1x128xf32>
    %216 = arith.addf %214, %215 : vector<1x128xf32>
    %217 = arith.mulf %216, %216 : vector<1x128xf32>
    %cst_55 = arith.constant dense<0.000000e+00> : vector<1xf32>
    %218 = vector.multi_reduction <add>, %217, %cst_55 [1] : vector<1x128xf32> to vector<1xf32>
    %219 = vector.shape_cast %218 : vector<1xf32> to vector<1x1xf32>
    %220 = math.rsqrt %219 : vector<1x1xf32>
    %221 = vector.broadcast %216 : vector<1x128xf32> to vector<8x128xf32>
    %222 = arith.mulf %8, %221 : vector<8x128xf32>
    %cst_56 = arith.constant dense<0.000000e+00> : vector<8xf32>
    %223 = vector.multi_reduction <add>, %222, %cst_56 [1] : vector<8x128xf32> to vector<8xf32>
    %224 = vector.shape_cast %223 : vector<8xf32> to vector<8x1xf32>
    %225 = arith.mulf %224, %13 : vector<8x1xf32>
    %226 = vector.broadcast %220 : vector<1x1xf32> to vector<8x1xf32>
    %227 = arith.mulf %225, %226 : vector<8x1xf32>
    %228 = vector.broadcast %227 : vector<8x1xf32> to vector<8x128xf32>
    %229 = arith.mulf %228, %8 : vector<8x128xf32>
    %cst_57 = arith.constant dense<0.000000e+00> : vector<128xf32>
    %230 = vector.multi_reduction <add>, %229, %cst_57 [0] : vector<8x128xf32> to vector<128xf32>
    %231 = vector.shape_cast %230 : vector<128xf32> to vector<1x128xf32>
    %232 = arith.truncf %231 : vector<1x128xf32> to vector<1x128xbf16>
    %cst_58 = arith.constant dense<0.000000e+00> : vector<1x384xf32>
    %233 = tpu.matmul %232, %14, %cst_58 {dimension_numbers = #tpu.dot_dimension_numbers<[1], [0], [0], [1], [0, 0, 1, 1], [], []>} : vector<1x128xbf16>, vector<128x384xbf16>, vector<1x384xf32> -> vector<1x384xf32>
    %234 = arith.truncf %216 : vector<1x128xf32> to vector<1x128xbf16>
    %cst_59 = arith.constant dense<0.000000e+00> : vector<1x768xf32>
    %235 = tpu.matmul %234, %15, %cst_59 {dimension_numbers = #tpu.dot_dimension_numbers<[1], [0], [0], [1], [0, 0, 1, 1], [], []>} : vector<1x128xbf16>, vector<128x768xbf16>, vector<1x768xf32> -> vector<1x768xf32>
    %236 = vector.extract_strided_slice %235 {offsets = [0, 0], sizes = [1, 384], strides = [1, 1]} : vector<1x768xf32> to vector<1x384xf32>
    %237 = arith.addf %233, %236 : vector<1x384xf32>
    %238 = arith.addf %237, %17 : vector<1x384xf32>
    %239 = vector.extract_strided_slice %235 {offsets = [0, 384], sizes = [1, 384], strides = [1, 1]} : vector<1x768xf32> to vector<1x384xf32>
    %240 = arith.addf %239, %18 : vector<1x384xf32>
    %241 = vector.extract_strided_slice %238 {offsets = [0, 0], sizes = [1, 128], strides = [1, 1]} : vector<1x384xf32> to vector<1x128xf32>
    %242 = vector.extract_strided_slice %240 {offsets = [0, 0], sizes = [1, 128], strides = [1, 1]} : vector<1x384xf32> to vector<1x128xf32>
    %243 = arith.addf %241, %242 : vector<1x128xf32>
    %244 = arith.negf %243 : vector<1x128xf32>
    %245 = math.exp %244 : vector<1x128xf32>
    %cst_60 = arith.constant 1.000000e+00 : f32
    %246 = vector.broadcast %cst_60 : f32 to vector<1x128xf32>
    %247 = arith.addf %246, %245 : vector<1x128xf32>
    %248 = arith.divf %246, %247 : vector<1x128xf32>
    %249 = vector.extract_strided_slice %238 {offsets = [0, 128], sizes = [1, 128], strides = [1, 1]} : vector<1x384xf32> to vector<1x128xf32>
    %250 = vector.extract_strided_slice %240 {offsets = [0, 128], sizes = [1, 128], strides = [1, 1]} : vector<1x384xf32> to vector<1x128xf32>
    %251 = arith.addf %249, %250 : vector<1x128xf32>
    %252 = arith.negf %251 : vector<1x128xf32>
    %253 = math.exp %252 : vector<1x128xf32>
    %cst_61 = arith.constant 1.000000e+00 : f32
    %254 = vector.broadcast %cst_61 : f32 to vector<1x128xf32>
    %255 = arith.addf %254, %253 : vector<1x128xf32>
    %256 = arith.divf %254, %255 : vector<1x128xf32>
    %257 = vector.extract_strided_slice %238 {offsets = [0, 256], sizes = [1, 128], strides = [1, 1]} : vector<1x384xf32> to vector<1x128xf32>
    %258 = vector.extract_strided_slice %240 {offsets = [0, 256], sizes = [1, 128], strides = [1, 1]} : vector<1x384xf32> to vector<1x128xf32>
    %259 = arith.mulf %248, %258 : vector<1x128xf32>
    %260 = arith.addf %257, %259 : vector<1x128xf32>
    %261 = math.tanh %260 : vector<1x128xf32>
    %cst_62 = arith.constant 1.000000e+00 : f32
    %262 = vector.broadcast %cst_62 : f32 to vector<1x128xf32>
    %263 = arith.subf %262, %256 : vector<1x128xf32>
    %264 = arith.mulf %263, %261 : vector<1x128xf32>
    %265 = arith.mulf %256, %216 : vector<1x128xf32>
    %266 = arith.addf %264, %265 : vector<1x128xf32>
    %267 = arith.mulf %266, %266 : vector<1x128xf32>
    %cst_63 = arith.constant dense<0.000000e+00> : vector<1xf32>
    %268 = vector.multi_reduction <add>, %267, %cst_63 [1] : vector<1x128xf32> to vector<1xf32>
    %269 = vector.shape_cast %268 : vector<1xf32> to vector<1x1xf32>
    %270 = math.rsqrt %269 : vector<1x1xf32>
    %271 = vector.broadcast %266 : vector<1x128xf32> to vector<8x128xf32>
    %272 = arith.mulf %8, %271 : vector<8x128xf32>
    %cst_64 = arith.constant dense<0.000000e+00> : vector<8xf32>
    %273 = vector.multi_reduction <add>, %272, %cst_64 [1] : vector<8x128xf32> to vector<8xf32>
    %274 = vector.shape_cast %273 : vector<8xf32> to vector<8x1xf32>
    %275 = arith.mulf %274, %13 : vector<8x1xf32>
    %276 = vector.broadcast %270 : vector<1x1xf32> to vector<8x1xf32>
    %277 = arith.mulf %275, %276 : vector<8x1xf32>
    %278 = vector.broadcast %277 : vector<8x1xf32> to vector<8x128xf32>
    %279 = arith.mulf %278, %8 : vector<8x128xf32>
    %cst_65 = arith.constant dense<0.000000e+00> : vector<128xf32>
    %280 = vector.multi_reduction <add>, %279, %cst_65 [0] : vector<8x128xf32> to vector<128xf32>
    %281 = vector.shape_cast %280 : vector<128xf32> to vector<1x128xf32>
    %282 = arith.truncf %281 : vector<1x128xf32> to vector<1x128xbf16>
    %cst_66 = arith.constant dense<0.000000e+00> : vector<1x384xf32>
    %283 = tpu.matmul %282, %14, %cst_66 {dimension_numbers = #tpu.dot_dimension_numbers<[1], [0], [0], [1], [0, 0, 1, 1], [], []>} : vector<1x128xbf16>, vector<128x384xbf16>, vector<1x384xf32> -> vector<1x384xf32>
    %284 = arith.truncf %266 : vector<1x128xf32> to vector<1x128xbf16>
    %cst_67 = arith.constant dense<0.000000e+00> : vector<1x768xf32>
    %285 = tpu.matmul %284, %15, %cst_67 {dimension_numbers = #tpu.dot_dimension_numbers<[1], [0], [0], [1], [0, 0, 1, 1], [], []>} : vector<1x128xbf16>, vector<128x768xbf16>, vector<1x768xf32> -> vector<1x768xf32>
    %286 = vector.extract_strided_slice %285 {offsets = [0, 0], sizes = [1, 384], strides = [1, 1]} : vector<1x768xf32> to vector<1x384xf32>
    %287 = arith.addf %283, %286 : vector<1x384xf32>
    %288 = arith.addf %287, %17 : vector<1x384xf32>
    %289 = vector.extract_strided_slice %285 {offsets = [0, 384], sizes = [1, 384], strides = [1, 1]} : vector<1x768xf32> to vector<1x384xf32>
    %290 = arith.addf %289, %18 : vector<1x384xf32>
    %291 = vector.extract_strided_slice %288 {offsets = [0, 0], sizes = [1, 128], strides = [1, 1]} : vector<1x384xf32> to vector<1x128xf32>
    %292 = vector.extract_strided_slice %290 {offsets = [0, 0], sizes = [1, 128], strides = [1, 1]} : vector<1x384xf32> to vector<1x128xf32>
    %293 = arith.addf %291, %292 : vector<1x128xf32>
    %294 = arith.negf %293 : vector<1x128xf32>
    %295 = math.exp %294 : vector<1x128xf32>
    %cst_68 = arith.constant 1.000000e+00 : f32
    %296 = vector.broadcast %cst_68 : f32 to vector<1x128xf32>
    %297 = arith.addf %296, %295 : vector<1x128xf32>
    %298 = arith.divf %296, %297 : vector<1x128xf32>
    %299 = vector.extract_strided_slice %288 {offsets = [0, 128], sizes = [1, 128], strides = [1, 1]} : vector<1x384xf32> to vector<1x128xf32>
    %300 = vector.extract_strided_slice %290 {offsets = [0, 128], sizes = [1, 128], strides = [1, 1]} : vector<1x384xf32> to vector<1x128xf32>
    %301 = arith.addf %299, %300 : vector<1x128xf32>
    %302 = arith.negf %301 : vector<1x128xf32>
    %303 = math.exp %302 : vector<1x128xf32>
    %cst_69 = arith.constant 1.000000e+00 : f32
    %304 = vector.broadcast %cst_69 : f32 to vector<1x128xf32>
    %305 = arith.addf %304, %303 : vector<1x128xf32>
    %306 = arith.divf %304, %305 : vector<1x128xf32>
    %307 = vector.extract_strided_slice %288 {offsets = [0, 256], sizes = [1, 128], strides = [1, 1]} : vector<1x384xf32> to vector<1x128xf32>
    %308 = vector.extract_strided_slice %290 {offsets = [0, 256], sizes = [1, 128], strides = [1, 1]} : vector<1x384xf32> to vector<1x128xf32>
    %309 = arith.mulf %298, %308 : vector<1x128xf32>
    %310 = arith.addf %307, %309 : vector<1x128xf32>
    %311 = math.tanh %310 : vector<1x128xf32>
    %cst_70 = arith.constant 1.000000e+00 : f32
    %312 = vector.broadcast %cst_70 : f32 to vector<1x128xf32>
    %313 = arith.subf %312, %306 : vector<1x128xf32>
    %314 = arith.mulf %313, %311 : vector<1x128xf32>
    %315 = arith.mulf %306, %266 : vector<1x128xf32>
    %316 = arith.addf %314, %315 : vector<1x128xf32>
    %317 = arith.truncf %316 : vector<1x128xf32> to vector<1x128xbf16>
    %c0_71 = arith.constant 0 : index
    %c0_72 = arith.constant 0 : index
    %318 = vector.load %arg5[%c0_71, %c0_72] : memref<128x128xbf16, #tpu.memory_space<vmem>>, vector<128x128xbf16>
    %cst_73 = arith.constant dense<0.000000e+00> : vector<1x128xf32>
    %319 = tpu.matmul %317, %318, %cst_73 {dimension_numbers = #tpu.dot_dimension_numbers<[1], [0], [0], [1], [0, 0, 1, 1], [], []>} : vector<1x128xbf16>, vector<128x128xbf16>, vector<1x128xf32> -> vector<1x128xf32>
    %c0_74 = arith.constant 0 : index
    %c0_75 = arith.constant 0 : index
    %320 = vector.load %arg6[%c0_74, %c0_75] : memref<1x128xf32, #tpu.memory_space<vmem>>, vector<1x128xf32>
    %321 = arith.addf %319, %320 : vector<1x128xf32>
    %c0_76 = arith.constant 0 : index
    %c0_77 = arith.constant 0 : index
    %322 = vector.load %arg7[%c0_76, %c0_77] : memref<1x128xf32, #tpu.memory_space<vmem>>, vector<1x128xf32>
    tpu.vector_store %arg7[%c0_76, %c0_77], %321 {strides = array<i32>} : memref<1x128xf32, #tpu.memory_space<vmem>>, vector<1x128xf32>,
    return
  }
}

</mosaic_0001>

<bundles_post_ra>
// kernel: attention_decoder_forward.1
= control target key start
LH: loop header
LB: loop body
LE: loop exit
PB: predicated region body
PF: predicated region fallthrough
CT: control target
= control target key end

     0   :  { %12 = vsyncpa [#allocation5], 0  ;;  %s3881_s0 = inlined_call_operand.vmem [shape: f32[8,32], index: 0, kind: input, shape index: {}]   ;;  %s3882_s1 = inlined_call_operand.vmem [shape: f32[1,32], index: 1, kind: input, shape index: {}]   ;;  %s3883_s2 = inlined_call_operand.hbm [shape: bf16[128,384], index: 2, kind: input, shape index: {}]   ;;  %s3884_s3 = inlined_call_operand.hbm [shape: bf16[128,768], index: 3, kind: input, shape index: {}]   ;;  %s3885_s4 = inlined_call_operand.vmem [shape: f32[1,768], index: 4, kind: input, shape index: {}]   ;;  %s3886_s5 = inlined_call_operand.hbm [shape: bf16[128,128], index: 5, kind: input, shape index: {}]   ;;  %s3887_s6 = inlined_call_operand.hbm [shape: f32[1,128], index: 6, kind: input, shape index: {}]   ;;  %s3888_s7 = inlined_call_operand.vmem [shape: f32[1,128], index: 7, kind: output, shape index: {}]  }
   0x1   :  { %13 = vsyncpa [#allocation7], 0 }
   0x2   :  { %14 = vsyncpa [#allocation10], 0  ;;  %s2889_s24 = smov [#allocation6]   ;;  %s2795_s28 = scalar_lea.hbm %s3884_s3, 6144 }
   0x3   :  { %s36_s25 = sshll.u32 %s2889_s24, 4  ;;  %p2796_p0 = scmp.ne.s32.totalorder %s3884_s3, %s2795_s28  ;;  %s37_s25 = int_to_ptr.vmem [resolvable:$true] %s36_s25 }
   0x4   :  { %p2799_p1 = scmp.lt.u32.totalorder %s2795_s28, %s3884_s3 }
   0x6   :  { %p2801_p2 = pnand %p2799_p1, %p2796_p0 }
   0x8   :  { %2804 = shalt.err (!%p2801_p2)
}
   0x9   :  { %s2805_s10 = scalar_lea.vmem %s37_s25, 6144  ;;  %p2810_p4 = scmp.lt.s32.totalorder %s37_s25, %s37_s25 }
   0xa   :  { %p2806_p3 = scmp.ne.s32.totalorder %s37_s25, %s2805_s10  ;;  %p2811_p5 = scmp.lt.s32.totalorder %s2805_s10, %s2805_s10 }
   0xc   :  { %p2812_p6 = por %p2811_p5, %p2810_p4 }
   0xe   :  { %p2813_p7 = pnand %p2812_p6, %p2806_p3 }
  0x10   :  { %2816 = shalt.err (!%p2813_p7)
}
  0x11   :  { %s2890_s11 = smov 384   ;;  %s2891_s12 = smov 24  }
  0x12   :  { %42 = dma.hbm_to_vmem [thread:$0]  %s3884_s3, 6144, %s37_s25, [#allocation7], %s2890_s11, %s2890_s11, %s2891_s12  }
  0x13   :  { %s2892_s15 = smov [#allocation4]   ;;  %s2817_s19 = scalar_lea.hbm %s3883_s2, 3072 }
  0x14   :  { %s24_s16 = sshll.u32 %s2892_s15, 4  ;;  %p2818_p8 = scmp.ne.s32.totalorder %s3883_s2, %s2817_s19  ;;  %s25_s16 = int_to_ptr.vmem [resolvable:$true] %s24_s16 }
  0x15   :  { %p2821_p9 = scmp.lt.u32.totalorder %s2817_s19, %s3883_s2 }
  0x17   :  { %p2823_p10 = pnand %p2821_p9, %p2818_p8 }
  0x19   :  { %2826 = shalt.err (!%p2823_p10)
}
  0x1a   :  { %s2827_s24 = scalar_lea.vmem %s25_s16, 3072  ;;  %p2832_p12 = scmp.lt.s32.totalorder %s25_s16, %s25_s16 }
  0x1b   :  { %p2828_p11 = scmp.ne.s32.totalorder %s25_s16, %s2827_s24  ;;  %p2833_p13 = scmp.lt.s32.totalorder %s2827_s24, %s2827_s24 }
  0x1d   :  { %p2834_p0 = por %p2833_p13, %p2832_p12 }
  0x1f   :  { %p2835_p1 = pnand %p2834_p0, %p2828_p11 }
  0x21   :  { %2838 = shalt.err (!%p2835_p1)
}
  0x22   :  { %s2893_s3 = smov 192   ;;  %s2894_s25 = smov 12  }
  0x23   :  { %30 = dma.hbm_to_vmem [thread:$0]  %s3883_s2, 3072, %s25_s16, [#allocation5], %s2893_s3, %s2893_s3, %s2894_s25  }
  0x24   :  { %s2895_s28 = smov [#allocation8]   ;;  %s2839_s9 = scalar_lea.hbm %s3886_s5, 1024 }
  0x25   :  { %s50_s29 = sshll.u32 %s2895_s28, 4  ;;  %p2840_p2 = scmp.ne.s32.totalorder %s3886_s5, %s2839_s9  ;;  %s51_s29 = int_to_ptr.vmem [resolvable:$true] %s50_s29 }
  0x26   :  { %p2843_p3 = scmp.lt.u32.totalorder %s2839_s9, %s3886_s5 }
  0x28   :  { %p2845_p4 = pnand %p2843_p3, %p2840_p2 }
  0x2a   :  { %2848 = shalt.err (!%p2845_p4)
}
  0x2b   :  { %s2849_s14 = scalar_lea.vmem %s51_s29, 1024  ;;  %p2854_p6 = scmp.lt.s32.totalorder %s51_s29, %s51_s29 }
  0x2c   :  { %p2850_p5 = scmp.ne.s32.totalorder %s51_s29, %s2849_s14  ;;  %p2855_p7 = scmp.lt.s32.totalorder %s2849_s14, %s2849_s14 }
  0x2e   :  { %p2856_p8 = por %p2855_p7, %p2854_p6 }
  0x30   :  { %p2857_p9 = pnand %p2856_p8, %p2850_p5 }
  0x32   :  { %2860 = shalt.err (!%p2857_p9)
}
  0x33   :  { %s2896_s2 = smov 64   ;;  %s2897_s15 = smov 4  }
  0x34   :  { %56 = dma.hbm_to_vmem [thread:$0]  %s3886_s5, 1024, %s51_s29, [#allocation7], %s2896_s2, %s2896_s2, %s2897_s15  }
  0x35   :  { %s2898_s18 = smov [#allocation9]   ;;  %s2861_s22 = scalar_lea.hbm %s3887_s6, 16 }
  0x36   :  { %s63_s19 = sshll.u32 %s2898_s18, 4  ;;  %p2862_p10 = scmp.ne.s32.totalorder %s3887_s6, %s2861_s22  ;;  %s64_s19 = int_to_ptr.vmem [resolvable:$true] %s63_s19 }
  0x37   :  { %p2865_p11 = scmp.lt.u32.totalorder %s2861_s22, %s3887_s6 }
  0x39   :  { %p2867_p12 = pnand %p2865_p11, %p2862_p10 }
  0x3b   :  { %2870 = shalt.err (!%p2867_p12)
}
  0x3c   :  { %s2871_s26 = scalar_lea.vmem %s64_s19, 16  ;;  %s2875_s5 = scalar_lea.vmem %s64_s19, 32 }
  0x3d   :  { %p2872_p13 = scmp.ne.s32.totalorder %s64_s19, %s2871_s26  ;;  %p2876_p0 = scmp.lt.s32.totalorder %s64_s19, %s64_s19 }
  0x3e   :  { %p2877_p1 = scmp.lt.s32.totalorder %s2875_s5, %s2871_s26 }
  0x40   :  { %p2878_p2 = por %p2877_p1, %p2876_p0 }
  0x42   :  { %p2879_p3 = pnand %p2878_p2, %p2872_p13 }
  0x44   :  { %2882 = shalt.err (!%p2879_p3)
}
  0x45   :  { %66 = dma.hbm_to_vmem [thread:$0]  %s3887_s6, 16, %s64_s19, [#allocation10]  }
  0x46   :  { %2883 = dma.done.wait [#allocation5], 3072  }
  0x47   :  { %2884 = vsyncadd [#allocation5], 4294964224 }
  0x48   :  { %2885 = dma.done.wait [#allocation7], 7168  }
  0x49   :  { %2886 = vsyncadd [#allocation7], 4294960128 }
  0x4a   :  { %2887 = dma.done.wait [#allocation10], 16  }
  0x4b   :  { %2888 = vsyncadd [#allocation10], 4294967280  ;;  %v3889_v0 = vmov 0.0   ;;  %v182_v1 = vlaneseq  ;;  %vm82_vm0 = vcmask 261120   ;;  %vm86_vm1 = vcmask 253952   ;;  %v81_v2 = vld [vmem:[%s3881_s0] sm:$0xff] }
  0x4c   :  { %80 = vst [vmem:[#allocation2] sm:$0xff] %v3889_v0  ;;  %84 = vst [vmem:[#allocation3] sm:$0x1] %v3889_v0  ;;  %2355 = vmatprep.subr.bf16.mxu1 %v3889_v0  ;;  %v85_v3 = vld [vmem:[%s3882_s1] sm:$0x1]  ;;  %vm176_vm2 = vcmask 1040384  }
  0x4d   :  { %83 = vst.msk [vmem:[#allocation2] sm:$0xff] %vm82_vm0, %v81_v2  ;;  %v2999_v4 = vshrl.u32 %v182_v1, 7  ;;  %v3016_v13 = vld [vmem:[#allocation4 + $0x4] ss:$12 sps:$4 sm:$0xff]   ;;  %v3018_v14 = vld [vmem:[#allocation4] ss:$12 sps:$4 sm:$0xff]  }
  0x4e   :  { %87 = vst.msk [vmem:[#allocation3] sm:$0x1] %vm86_vm1, %v85_v3  ;;  %3995 = vst [vmem:[#allocation14_spill] sm:$0xff] %v3016_v13  ;;  %349 = vmatprep.subr.bf16.mxu0 %v3016_v13  ;;  %v3021_v15 = vld [vmem:[#allocation4 + $0x8] ss:$12 sps:$4 sm:$0xff]   ;;  %v3891_v35 = vmov 0  }
  0x4f   :  { %v3002_v5 = vsub.s32 0, %v2999_v4  ;;  %3996 = vst [vmem:[#allocation15_spill] sm:$0xff] %v3021_v15  ;;  %350 = vmatpush1.bf16.msra.mxu0 %v3018_v14  ;;  %2356 = vmatpush3.bf16.msra.mxu1 %v3021_v15  ;;  %v3025_v16 = vld [vmem:[#allocation4 + $0x1c] ss:$12 sps:$4 sm:$0xff]   ;;  %v3027_v17 = vld [vmem:[#allocation4 + $0x18] ss:$12 sps:$4 sm:$0xff]  }
  0x50   :  { %v3029_v18 = vld [vmem:[#allocation4 + $0x20] ss:$12 sps:$4 sm:$0xff]   ;;  %2357 = vmatprep.subr.bf16.mxu1 %v3889_v0  ;;  %351 = vmatprep.subr.bf16.mxu0 %v3025_v16  ;;  %v3038_v20 = vld [vmem:[#allocation4 + $0x30] ss:$12 sps:$4 sm:$0xff]   ;;  %v3041_v21 = vld [vmem:[#allocation4 + $0x38] ss:$12 sps:$4 sm:$0xff]  }
  0x51   :  { %3997 = vst [vmem:[#allocation16_spill] sm:$0xff] %v3029_v18  ;;  %v3032_v19 = vld [vmem:[#allocation4 + $0x34] ss:$12 sps:$4 sm:$0xff]   ;;  %3998 = vst [vmem:[#allocation17_spill] sm:$0xff] %v3041_v21  ;;  %v3045_v22 = vld [vmem:[#allocation4 + $0x4c] ss:$12 sps:$4 sm:$0xff]   ;;  %381 = vmatprep.mubr.bf16.mxu0 %v3891_v35 }
  0x52   :  { %v3047_v23 = vld [vmem:[#allocation4 + $0x48] ss:$12 sps:$4 sm:$0xff]   ;;  %v3051_v24 = vld [vmem:[#allocation4 + $0x50] ss:$12 sps:$4 sm:$0xff]   ;;  %v3057_v26 = vld [vmem:[#allocation4 + $0x60] ss:$12 sps:$4 sm:$0xff]  }
  0x53   :  { %352 = vmatpush1.bf16.msra.mxu0 %v3027_v17  ;;  %2358 = vmatpush3.bf16.msra.mxu1 %v3029_v18  ;;  %3999 = vst [vmem:[#allocation18_spill] sm:$0xff] %v3051_v24  ;;  %v3055_v25 = vld [vmem:[#allocation4 + $0x64] ss:$12 sps:$4 sm:$0xff]   ;;  %v3061_v27 = vld [vmem:[#allocation4 + $0x68] ss:$12 sps:$4 sm:$0xff]   ;;  %vm2901_vm3 = vmmov 0  }
  0x54   :  { %v3004_v6 = vld [vmem:[#allocation2] sm:$0xff]  ;;  %353 = vmatprep.subr.bf16.mxu0 %v3032_v19  ;;  %2359 = vmatprep.subr.bf16.mxu1 %v3889_v0  ;;  %4000 = vst [vmem:[#allocation19_spill] sm:$0xff] %v3061_v27  ;;  %v3071_v30 = vld [vmem:[#allocation4 + $0x80] ss:$12 sps:$4 sm:$0xff]   ;;  %v3095_v38 = vld [vmem:[#allocation6 + $0x10] ss:$24 sps:$4 sm:$0xff]  }
  0x55   :  { %v3006_v7 = vld [vmem:[#allocation3] sm:$0x1]  ;;  %v90_v8 = vmul.f32 %v3004_v6, %v3004_v6  ;;  %v3067_v29 = vld [vmem:[#allocation4 + $0x78] ss:$12 sps:$4 sm:$0xff]   ;;  %4001 = vst [vmem:[#allocation20_spill] sm:$0xff] %v3071_v30  ;;  %2371 = vmatprep.mubr.msk.bf16.mxu1 %vm2901_vm3, %v3889_v0 }
  0x56   :  { %v175_v9 = vmul.f32 %v3006_v7, %v3006_v7  ;;  %v185_v10 = vrot.slane %v3006_v7, %v3002_v5  ;;  %v3065_v28 = vld [vmem:[#allocation4 + $0x7c] ss:$12 sps:$4 sm:$0xff]   ;;  %v3074_v31 = vld [vmem:[#allocation4 + $0x94] ss:$12 sps:$4 sm:$0xff]   ;;  %v3079_v33 = vld [vmem:[#allocation4 + $0x98] ss:$12 sps:$4 sm:$0xff]  }
  0x57   :  { %91 = vadd.xlane.f32.xlu0 %v90_v8  ;;  %354 = vmatpush1.bf16.msra.mxu0 %v3038_v20  ;;  %v3076_v32 = vld [vmem:[#allocation4 + $0x90] ss:$12 sps:$4 sm:$0xff]   ;;  %4002 = vst [vmem:[#allocation21_spill] sm:$0xff] %v3079_v33  ;;  %v3081_v34 = vld [vmem:[#allocation4 + $0xac] ss:$12 sps:$4 sm:$0xff]  }
  0x58   :  { %v187_v11 = vmul.f32 %v185_v10, %v3004_v6  ;;  %v177_v12 = vsel %vm176_vm2, %v175_v9, 0.0  ;;  %2360 = vmatpush3.bf16.msra.mxu1 %v3041_v21  ;;  %355 = vmatprep.subr.bf16.mxu0 %v3045_v22  ;;  %v3089_v36 = vld [vmem:[#allocation4 + $0xa8] ss:$12 sps:$4 sm:$0xff]   ;;  %v3093_v37 = vld [vmem:[#allocation4 + $0xb0] ss:$12 sps:$4 sm:$0xff]  }
  0x59   :  { %2361 = vmatprep.subr.bf16.mxu1 %v3889_v0  ;;  %4003 = vst [vmem:[#allocation22_spill] sm:$0xff] %v3089_v36  ;;  %4004 = vst [vmem:[#allocation23_spill] sm:$0xff] %v3093_v37  ;;  %v3107_v54 = vld [vmem:[#allocation6 + $0xc] ss:$24 sps:$4 sm:$0xff]   ;;  %v3111_v57 = vld [vmem:[#allocation6 + $0x40] ss:$24 sps:$4 sm:$0xff]  }
  0x5a   :  { %188 = vadd.xlane.f32.xlu1 %v187_v11  ;;  %4006 = vst [vmem:[#allocation25_spill] sm:$0xff] %v3107_v54  ;;  %v3109_v55 = vld [vmem:[#allocation6 + $0x14] ss:$24 sps:$4 sm:$0xff]   ;;  %v3117_v59 = vld [vmem:[#allocation6 + $0x44] ss:$24 sps:$4 sm:$0xff]  }
  0x5b   :  { %178 = vadd.xlane.f32.xlu0 %v177_v12  ;;  %356 = vmatpush1.bf16.msra.mxu0 %v3047_v23  ;;  %4007 = vst [vmem:[#allocation26_spill] sm:$0xff] %v3109_v55  ;;  %v3114_v58 = vld [vmem:[#allocation6 + $0x3c] ss:$24 sps:$4 sm:$0xff]   ;;  %v3120_v60 = vld [vmem:[#allocation6 + $0x70] ss:$24 sps:$4 sm:$0xff]  }
  0x5c   :  { %2362 = vmatpush3.bf16.msra.mxu1 %v3051_v24  ;;  %357 = vmatprep.subr.bf16.mxu0 %v3055_v25  ;;  %4008 = vst [vmem:[#allocation27_spill] sm:$0xff] %v3114_v58  ;;  %v3127_v61 = vld [vmem:[#allocation6 + $0x6c] ss:$24 sps:$4 sm:$0xff]   ;;  %v3133_v63 = vld [vmem:[#allocation6 + $0xa0] ss:$24 sps:$4 sm:$0xff]  }
  0x5d   :  { %2363 = vmatprep.subr.bf16.mxu1 %v3889_v0  ;;  %4009 = vst [vmem:[#allocation28_spill] sm:$0xff] %v3127_v61  ;;  %v3130_v62 = vld [vmem:[#allocation6 + $0x74] ss:$24 sps:$4 sm:$0xff]   ;;  %v3140_v2 = vld [vmem:[#allocation6 + $0xa4] ss:$24 sps:$4 sm:$0xff]  }
  0x5e   :  { %v3137_v1 = vld [vmem:[#allocation6 + $0x9c] ss:$24 sps:$4 sm:$0xff]   ;;  %v3143_v3 = vld [vmem:[#allocation6 + $0xd0] ss:$24 sps:$4 sm:$0xff]   ;;  %v3147_v8 = vld [vmem:[#allocation6 + $0xcc] ss:$24 sps:$4 sm:$0xff]  }
  0x5f   :  { %358 = vmatpush1.bf16.msra.mxu0 %v3057_v26  ;;  %4010 = vst [vmem:[#allocation29_spill] sm:$0xff] %v3137_v1  ;;  %4011 = vst [vmem:[#allocation30_spill] sm:$0xff] %v3147_v8  ;;  %v3150_v9 = vld [vmem:[#allocation6 + $0xd4] ss:$24 sps:$4 sm:$0xff]   ;;  %v3153_v10 = vld [vmem:[#allocation6 + $0x100] ss:$24 sps:$4 sm:$0xff]  }
  0x60   :  { %2364 = vmatpush3.bf16.msra.mxu1 %v3061_v27  ;;  %359 = vmatprep.subr.bf16.mxu0 %v3065_v28  ;;  %v3157_v11 = vld [vmem:[#allocation6 + $0xfc] ss:$24 sps:$4 sm:$0xff]  }
  0x61   :  { %2365 = vmatprep.subr.bf16.mxu1 %v3889_v0  ;;  %4012 = vst [vmem:[#allocation31_spill] sm:$0xff] %v3157_v11  ;;  %v3160_v12 = vld [vmem:[#allocation6 + $0x104] ss:$24 sps:$4 sm:$0xff]  }
  0x63   :  { %360 = vmatpush1.bf16.msra.mxu0 %v3067_v29 }
  0x64   :  { %2366 = vmatpush3.bf16.msra.mxu1 %v3071_v30  ;;  %361 = vmatprep.subr.bf16.mxu0 %v3074_v31 }
  0x65   :  { %2367 = vmatprep.subr.bf16.mxu1 %v3889_v0 }
  0x67   :  { %362 = vmatpush1.bf16.msra.mxu0 %v3076_v32 }
  0x68   :  { %2368 = vmatpush3.bf16.msra.mxu1 %v3079_v33  ;;  %363 = vmatprep.subr.bf16.mxu0 %v3081_v34 }
  0x69   :  { %2369 = vmatprep.subr.bf16.mxu1 %v3889_v0 }
  0x6b   :  { %364 = vmatpush1.bf16.msra.mxu0 %v3089_v36 }
  0x6c   :  { %2370 = vmatpush3.bf16.msra.mxu1 %v3093_v37  ;;  %573 = vmatprep.subr.bf16.mxu0 %v3095_v38 }
  0x6d   :  { %2375 = vmatprep.subr.bf16.mxu1 %v3889_v0 }
  0xe4   :  { %v92_v39 = vpop.xlane.xlu0 %91 }
  0xe5   :  { %2648 = vrsqrt.f32 %v92_v39  ;;  %v3163_v39 = vld [vmem:[#allocation6 + $0x130] ss:$24 sps:$4 sm:$0xff]  }
  0xe7   :  { %v189_v42 = vpop.xlane.xlu1 %188 }
  0xe8   :  { %v179_v40 = vpop.xlane.xlu0 %178 }
  0xe9   :  { %2650 = vrsqrt.f32 %v179_v40  ;;  %v3167_v40 = vld [vmem:[#allocation6 + $0x12c] ss:$24 sps:$4 sm:$0xff]  }
  0xea   :  { %4013 = vst [vmem:[#allocation32_spill] sm:$0xff] %v3167_v40 }
  0xef   :  { %v3102_v41 = vpop.eup %2648 }
  0xf0   :  { %4005 = vst [vmem:[#allocation24_spill] sm:$0xff] %v3102_v41  ;;  %v190_v44 = vmul.f32 %v3102_v41, %v189_v42  ;;  %v3170_v42 = vld [vmem:[#allocation6 + $0x134] ss:$24 sps:$4 sm:$0xff]  }
  0xf3   :  { %v2651_v43 = vpop.eup %2650 }
  0xf4   :  { %v194_v45 = vrot.slane %v2651_v43, %v3002_v5  ;;  %v3173_v43 = vld [vmem:[#allocation6 + $0x160] ss:$24 sps:$4 sm:$0xff]  }
  0xf6   :  { %v195_v46 = vmul.f32 %v194_v45, %v190_v44  ;;  %v3177_v44 = vld [vmem:[#allocation6 + $0x15c] ss:$24 sps:$4 sm:$0xff]  }
  0xf7   :  { %4014 = vst [vmem:[#allocation33_spill] sm:$0xff] %v3177_v44  ;;  %v3180_v45 = vld [vmem:[#allocation6 + $0x164] ss:$24 sps:$4 sm:$0xff]  }
  0xf8   :  { %v196_v47 = vmul.f32 %v195_v46, %v3004_v6  ;;  %v204_v46 = vpack.c.bf16 %v3006_v7, %v3006_v7 }
  0xfa   :  { %v197_v48 = vrot.slane %v196_v47, 4 }
  0xfc   :  { %v198_v49 = vadd.f32 %v197_v48, %v196_v47  ;;  %v3191_v47 = vld [vmem:[#allocation6 + $0x4] ss:$24 sps:$4 sm:$0xff]   ;;  %v3193_v48 = vld [vmem:[#allocation6] ss:$24 sps:$4 sm:$0xff]  }
  0xfd   :  { %4015 = vst [vmem:[#allocation34_spill] sm:$0xff] %v3191_v47  ;;  %4016 = vst [vmem:[#allocation35_spill] sm:$0xff] %v3193_v48 }
  0xfe   :  { %v199_v50 = vrot.slane %v198_v49, 2 }
 0x100   :  { %v200_v51 = vadd.f32 %v199_v50, %v198_v49  ;;  %v3196_v49 = vld [vmem:[#allocation6 + $0x8] ss:$24 sps:$4 sm:$0xff]   ;;  %v3200_v50 = vld [vmem:[#allocation6 + $0x34] ss:$24 sps:$4 sm:$0xff]  }
 0x101   :  { %4017 = vst [vmem:[#allocation36_spill] sm:$0xff] %v3196_v49  ;;  %4018 = vst [vmem:[#allocation37_spill] sm:$0xff] %v3200_v50 }
 0x102   :  { %v201_v52 = vrot.slane %v200_v51, 1 }
 0x104   :  { %v202_v53 = vadd.f32 %v201_v52, %v200_v51  ;;  %v3202_v51 = vld [vmem:[#allocation6 + $0x30] ss:$24 sps:$4 sm:$0xff]  }
 0x105   :  { %4019 = vst [vmem:[#allocation38_spill] sm:$0xff] %v3202_v51  ;;  %v3206_v52 = vld [vmem:[#allocation6 + $0x38] ss:$24 sps:$4 sm:$0xff]  }
 0x106   :  { %v203_v56 = vpack.c.bf16 %v202_v53, %v202_v53  ;;  %4020 = vst [vmem:[#allocation39_spill] sm:$0xff] %v3206_v52  ;;  %v3210_v53 = vld [vmem:[#allocation6 + $0x64] ss:$24 sps:$4 sm:$0xff]  }
 0x107   :  { %4021 = vst [vmem:[#allocation40_spill] sm:$0xff] %v3210_v53 }
 0x108   :  { %382 = vmatmul.mubr.bf16.vlgmr.msra.gmra.mrb[0].mxu0 %v203_v56  ;;  %2372 = vmatmul.mubr.bf16.vlgmr.msra.gmra.mrb[0].mxu1 %v203_v56  ;;  %v3212_v56 = vld [vmem:[#allocation6 + $0x60] ss:$24 sps:$4 sm:$0xff]  }
 0x109   :  { %574 = vmatpush1.bf16.msra.mxu0 %v3107_v54  ;;  %2376 = vmatpush3.bf16.msra.mxu1 %v3109_v55  ;;  %4022 = vst [vmem:[#allocation41_spill] sm:$0xff] %v3212_v56 }
 0x10a   :  { %575 = vmatprep.subr.bf16.mxu0 %v3111_v57  ;;  %2377 = vmatprep.subr.bf16.mxu1 %v3889_v0 }
 0x10b   :  { %605 = vmatprep.mubr.bf16.mxu0 %v3891_v35  ;;  %2391 = vmatprep.mubr.msk.bf16.mxu1 %vm2901_vm3, %v3889_v0 }
 0x10d   :  { %576 = vmatpush1.bf16.msra.mxu0 %v3114_v58  ;;  %2378 = vmatpush3.bf16.msra.mxu1 %v3117_v59 }
 0x10e   :  { %577 = vmatprep.subr.bf16.mxu0 %v3120_v60  ;;  %2379 = vmatprep.subr.bf16.mxu1 %v3889_v0 }
 0x111   :  { %578 = vmatpush1.bf16.msra.mxu0 %v3127_v61  ;;  %2380 = vmatpush3.bf16.msra.mxu1 %v3130_v62 }
 0x112   :  { %579 = vmatprep.subr.bf16.mxu0 %v3133_v63  ;;  %2381 = vmatprep.subr.bf16.mxu1 %v3889_v0 }
 0x115   :  { %580 = vmatpush1.bf16.msra.mxu0 %v3137_v1  ;;  %2382 = vmatpush3.bf16.msra.mxu1 %v3140_v2 }
 0x116   :  { %581 = vmatprep.subr.bf16.mxu0 %v3143_v3  ;;  %2383 = vmatprep.subr.bf16.mxu1 %v3889_v0 }
 0x119   :  { %582 = vmatpush1.bf16.msra.mxu0 %v3147_v8  ;;  %2384 = vmatpush3.bf16.msra.mxu1 %v3150_v9 }
 0x11a   :  { %583 = vmatprep.subr.bf16.mxu0 %v3153_v10  ;;  %2385 = vmatprep.subr.bf16.mxu1 %v3889_v0 }
 0x11d   :  { %584 = vmatpush1.bf16.msra.mxu0 %v3157_v11  ;;  %2386 = vmatpush3.bf16.msra.mxu1 %v3160_v12 }
 0x11e   :  { %585 = vmatprep.subr.bf16.mxu0 %v3163_v39  ;;  %2387 = vmatprep.subr.bf16.mxu1 %v3889_v0 }
 0x121   :  { %586 = vmatpush1.bf16.msra.mxu0 %v3167_v40  ;;  %2388 = vmatpush3.bf16.msra.mxu1 %v3170_v42 }
 0x122   :  { %587 = vmatprep.subr.bf16.mxu0 %v3173_v43  ;;  %2389 = vmatprep.subr.bf16.mxu1 %v3889_v0  ;;  %v3220_v0 = vld [vmem:[#allocation6 + $0x94] ss:$24 sps:$4 sm:$0xff]  }
 0x123   :  { %4024 = vst [vmem:[#allocation43_spill] sm:$0xff] %v3220_v0 }
 0x125   :  { %588 = vmatpush1.bf16.msra.mxu0 %v3177_v44  ;;  %2390 = vmatpush3.bf16.msra.mxu1 %v3180_v45 }
 0x126   :  { %855 = vmatprep.subr.bf16.mxu1 %v3107_v54  ;;  %814 = vmatprep.subr.bf16.mxu0 %v3191_v47 }
 0x128   :  { %606 = vmatmul.mubr.bf16.vlgmr.msra.gmra.mrb[0].mxu0 %v204_v46  ;;  %2392 = vmatmul.mubr.bf16.vlgmr.msra.gmra.mrb[4].mxu1 %v204_v46  ;;  %v3216_v46 = vld [vmem:[#allocation6 + $0x68] ss:$24 sps:$4 sm:$0xff]  }
 0x129   :  { %846 = vmatprep.mubr.bf16.mxu0 %v3891_v35  ;;  %887 = vmatprep.mubr.bf16.mxu1 %v3891_v35  ;;  %4023 = vst [vmem:[#allocation42_spill] sm:$0xff] %v3216_v46  ;;  %v3222_v35 = vld [vmem:[#allocation6 + $0x90] ss:$24 sps:$4 sm:$0xff]  }
 0x12a   :  { %815 = vmatpush1.bf16.msra.mxu0 %v3193_v48  ;;  %856 = vmatpush1.bf16.msra.mxu1 %v3196_v49  ;;  %4025 = vst [vmem:[#allocation44_spill] sm:$0xff] %v3222_v35 }
 0x12b   :  { %857 = vmatprep.subr.bf16.mxu1 %v3114_v58  ;;  %816 = vmatprep.subr.bf16.mxu0 %v3200_v50 }
 0x12e   :  { %817 = vmatpush1.bf16.msra.mxu0 %v3202_v51  ;;  %858 = vmatpush1.bf16.msra.mxu1 %v3206_v52  ;;  %v3226_v52 = vld [vmem:[#allocation6 + $0x98] ss:$24 sps:$4 sm:$0xff]  }
 0x12f   :  { %859 = vmatprep.subr.bf16.mxu1 %v3127_v61  ;;  %818 = vmatprep.subr.bf16.mxu0 %v3210_v53  ;;  %4026 = vst [vmem:[#allocation45_spill] sm:$0xff] %v3226_v52  ;;  %v3230_v61 = vld [vmem:[#allocation6 + $0xc4] ss:$24 sps:$4 sm:$0xff]   ;;  %v3232_v53 = vld [vmem:[#allocation6 + $0xc0] ss:$24 sps:$4 sm:$0xff]  }
 0x130   :  { %4027 = vst [vmem:[#allocation46_spill] sm:$0xff] %v3230_v61  ;;  %4028 = vst [vmem:[#allocation47_spill] sm:$0xff] %v3232_v53 }
 0x132   :  { %819 = vmatpush1.bf16.msra.mxu0 %v3212_v56  ;;  %860 = vmatpush1.bf16.msra.mxu1 %v3216_v46  ;;  %v3236_v46 = vld [vmem:[#allocation6 + $0xc8] ss:$24 sps:$4 sm:$0xff]  }
 0x133   :  { %861 = vmatprep.subr.bf16.mxu1 %v3137_v1  ;;  %820 = vmatprep.subr.bf16.mxu0 %v3220_v0  ;;  %4029 = vst [vmem:[#allocation48_spill] sm:$0xff] %v3236_v46  ;;  %v3240_v1 = vld [vmem:[#allocation6 + $0xf4] ss:$24 sps:$4 sm:$0xff]   ;;  %v3242_v0 = vld [vmem:[#allocation6 + $0xf0] ss:$24 sps:$4 sm:$0xff]  }
 0x134   :  { %4030 = vst [vmem:[#allocation49_spill] sm:$0xff] %v3240_v1  ;;  %4031 = vst [vmem:[#allocation50_spill] sm:$0xff] %v3242_v0 }
 0x136   :  { %821 = vmatpush1.bf16.msra.mxu0 %v3222_v35  ;;  %862 = vmatpush1.bf16.msra.mxu1 %v3226_v52  ;;  %v3246_v52 = vld [vmem:[#allocation6 + $0xf8] ss:$24 sps:$4 sm:$0xff]  }
 0x137   :  { %863 = vmatprep.subr.bf16.mxu1 %v3147_v8  ;;  %822 = vmatprep.subr.bf16.mxu0 %v3230_v61  ;;  %4032 = vst [vmem:[#allocation51_spill] sm:$0xff] %v3246_v52  ;;  %v3250_v8 = vld [vmem:[#allocation6 + $0x124] ss:$24 sps:$4 sm:$0xff]   ;;  %v3252_v61 = vld [vmem:[#allocation6 + $0x120] ss:$24 sps:$4 sm:$0xff]  }
 0x138   :  { %4033 = vst [vmem:[#allocation52_spill] sm:$0xff] %v3250_v8  ;;  %4034 = vst [vmem:[#allocation53_spill] sm:$0xff] %v3252_v61 }
 0x13a   :  { %823 = vmatpush1.bf16.msra.mxu0 %v3232_v53  ;;  %864 = vmatpush1.bf16.msra.mxu1 %v3236_v46  ;;  %v3256_v46 = vld [vmem:[#allocation6 + $0x128] ss:$24 sps:$4 sm:$0xff]  }
 0x13b   :  { %865 = vmatprep.subr.bf16.mxu1 %v3157_v11  ;;  %824 = vmatprep.subr.bf16.mxu0 %v3240_v1  ;;  %4035 = vst [vmem:[#allocation54_spill] sm:$0xff] %v3256_v46  ;;  %v3260_v11 = vld [vmem:[#allocation6 + $0x154] ss:$24 sps:$4 sm:$0xff]   ;;  %v3262_v1 = vld [vmem:[#allocation6 + $0x150] ss:$24 sps:$4 sm:$0xff]  }
 0x13c   :  { %4036 = vst [vmem:[#allocation55_spill] sm:$0xff] %v3260_v11  ;;  %4037 = vst [vmem:[#allocation56_spill] sm:$0xff] %v3262_v1 }
 0x13e   :  { %825 = vmatpush1.bf16.msra.mxu0 %v3242_v0  ;;  %866 = vmatpush1.bf16.msra.mxu1 %v3246_v52  ;;  %v3265_v52 = vld [vmem:[#allocation6 + $0x158] ss:$24 sps:$4 sm:$0xff]   ;;  %v560_v0 = vsub.s32 3, %v2999_v4 }
 0x13f   :  { %867 = vmatprep.subr.bf16.mxu1 %v3167_v40  ;;  %826 = vmatprep.subr.bf16.mxu0 %v3250_v8  ;;  %4038 = vst [vmem:[#allocation57_spill] sm:$0xff] %v3265_v52 }
 0x142   :  { %827 = vmatpush1.bf16.msra.mxu0 %v3252_v61  ;;  %868 = vmatpush1.bf16.msra.mxu1 %v3256_v46 }
 0x143   :  { %869 = vmatprep.subr.bf16.mxu1 %v3177_v44  ;;  %828 = vmatprep.subr.bf16.mxu0 %v3260_v11  ;;  %v174_v44 = vld [vmem:[%s3885_s4] sm:$0x3f]  ;;  %v340_v11 = vsub.s32 1, %v2999_v4 }
 0x146   :  { %829 = vmatpush1.bf16.msra.mxu0 %v3262_v1  ;;  %870 = vmatpush1.bf16.msra.mxu1 %v3265_v52  ;;  %v564_v1 = vsub.s32 4, %v2999_v4  ;;  %v3279_v52 = vrot.slane %v174_v44, %v3002_v5 }
 0x147   :  { %896 = vmatprep.subr.bf16.mxu0 %v3109_v55  ;;  %937 = vmatprep.subr.bf16.mxu1 %v3016_v13  ;;  %v3281_v55 = vrot.slane %v174_v44, %v560_v0  ;;  %v3283_v13 = vrot.slane %v174_v44, %v340_v11 }
 0x148   :  { %4039 = vst [vmem:[#allocation58_spill] sm:$0xff] %v3279_v52 }
 0x149   :  { %4040 = vst [vmem:[#allocation59_spill] sm:$0xff] %v3283_v13 }
 0x1db   :  { %v424_v61 = vpop.f32.mrb[0].mxu1 }
 0x1dc   :  { %v2373_v46 = vpop.f32.mrb[1].mxu1 }
 0x1dd   :  { %v427_v40 = vpop.f32.mrb[2].mxu1  ;;  %v3285_v46 = vrot.slane %v174_v44, %v564_v1 }
 0x1de   :  { %v2374_v8 = vpop.f32.mrb[3].mxu1 }
 0x1df   :  { %4041 = vst [vmem:[#allocation60_spill] sm:$0xff] %v3285_v46  ;;  %v2515_v8 = vadd.f32 %v3281_v55, %v3279_v52  ;;  %v2517_v53 = vadd.f32 %v3285_v46, %v3283_v13  ;;  %v568_v52 = vsub.s32 5, %v2999_v4  ;;  %v344_v13 = vsub.s32 2, %v2999_v4 }
 0x1e1   :  { %v3293_v46 = vrot.slane %v174_v44, %v568_v52 }
 0x1fb   :  { %v607_v40 = vpop.f32.mrb[0].mxu0  ;;  %v648_v35 = vpop.f32.mrb[4].mxu1 }
 0x1fc   :  { %v2516_v56 = vadd.f32 %v2515_v8, %v607_v40  ;;  %v609_v51 = vpop.f32.mrb[1].mxu0  ;;  %v2393_v58 = vpop.f32.mrb[5].mxu1 }
 0x1fd   :  { %v611_v50 = vpop.f32.mrb[2].mxu0  ;;  %v651_v49 = vpop.f32.mrb[6].mxu1  ;;  %v2518_v11 = vadd.f32 %v2517_v53, %v609_v51  ;;  %v3295_v58 = vrot.slane %v174_v44, %v344_v13 }
 0x1fe   :  { %v2239_v48 = vmul.f32 -1.442695, %v2516_v56  ;;  %v612_v0 = vpop.f32.mrb[3].mxu0  ;;  %v2394_v41 = vpop.f32.mrb[7].mxu1  ;;  %v649_v50 = vadd.f32 %v648_v35, %v3293_v46 }
 0x1ff   :  { %v2240_v1 = vmul.f32 -1.442695, %v2518_v11  ;;  %v4043_v11 = vmov 0.0  }
 0x200   :  { %2652 = vpow2.f32 %v2239_v48  ;;  %v425_v48 = vadd.f32 %v424_v61, %v3295_v58 }
 0x201   :  { %2654 = vpow2.f32 %v2240_v1  ;;  %v4044_v1 = vld [vmem:[#allocation23_spill] sm:$0xff] }
 0x20a   :  { %v2653_v54 = vpop.eup %2652 }
 0x20b   :  { %v658_v37 = vadd.f32 1.0, %v2653_v54  ;;  %v2655_v8 = vpop.eup %2654 }
 0x20c   :  { %v665_v49 = vadd.f32 1.0, %v2655_v8  ;;  %v4045_v8 = vld [vmem:[#allocation25_spill] sm:$0xff] }
 0x20d   :  { %2656 = vrcp.f32 %v658_v37 }
 0x20e   :  { %2658 = vrcp.f32 %v665_v49 }
 0x217   :  { %v2657_v41 = vpop.eup %2656 }
 0x218   :  { %v668_v51 = vmul.f32 %v2657_v41, %v649_v50  ;;  %v2659_v54 = vpop.eup %2658 }
 0x219   :  { %v671_v56 = vsub.f32 1.0, %v2659_v54  ;;  %v673_v4 = vmul.f32 %v2659_v54, %v3006_v7  ;;  %v4042_v7 = vmov 0  }
 0x21a   :  { %v669_v53 = vadd.f32 %v668_v51, %v425_v48  ;;  %v4046_v48 = vld [vmem:[#allocation24_spill] sm:$0xff] }
 0x21c   :  { %2660 = vtanh.f32 %v669_v53 }
 0x226   :  { %v2661_v37 = vpop.eup %2660 }
 0x227   :  { %v672_v52 = vmul.f32 %v2661_v37, %v671_v56 }
 0x229   :  { %v3300_v40 = vadd.f32 %v673_v4, %v672_v52 }
 0x22b   :  { %v701_v13 = vpack.c.bf16 %v3300_v40, %v3300_v40  ;;  %v675_v35 = vmul.f32 %v3300_v40, %v3300_v40  ;;  %v683_v61 = vrot.slane %v3300_v40, %v3002_v5 }
 0x22d   :  { %847 = vmatmul.mubr.bf16.vlgmr.msra.gmra.mrb[4].mxu0 %v701_v13  ;;  %888 = vmatmul.mubr.bf16.vlgmr.msra.gmra.mrb[8].mxu1 %v701_v13  ;;  %v676_v44 = vsel %vm176_vm2, %v675_v35, 0.0  ;;  %v684_v0 = vmul.f32 %v683_v61, %v3004_v6 }
 0x22e   :  { %897 = vmatpush1.bf16.msra.mxu0 %v3095_v38  ;;  %677 = vadd.xlane.f32.xlu1 %v676_v44 }
 0x22f   :  { %685 = vadd.xlane.f32.xlu0 %v684_v0  ;;  %898 = vmatprep.subr.bf16.mxu0 %v3117_v59  ;;  %v4047_v0 = vld [vmem:[#allocation35_spill] sm:$0xff] }
 0x230   :  { %928 = vmatprep.mubr.bf16.mxu0 %v4042_v7  ;;  %938 = vmatpush1.bf16.msra.mxu1 %v3018_v14 }
 0x231   :  { %939 = vmatprep.subr.bf16.mxu1 %v3025_v16  ;;  %969 = vmatprep.mubr.bf16.mxu1 %v4042_v7 }
 0x232   :  { %899 = vmatpush1.bf16.msra.mxu0 %v3111_v57 }
 0x233   :  { %900 = vmatprep.subr.bf16.mxu0 %v3130_v62 }
 0x234   :  { %940 = vmatpush1.bf16.msra.mxu1 %v3027_v17 }
 0x235   :  { %941 = vmatprep.subr.bf16.mxu1 %v3032_v19 }
 0x236   :  { %901 = vmatpush1.bf16.msra.mxu0 %v3120_v60 }
 0x237   :  { %902 = vmatprep.subr.bf16.mxu0 %v3140_v2 }
 0x238   :  { %942 = vmatpush1.bf16.msra.mxu1 %v3038_v20 }
 0x239   :  { %943 = vmatprep.subr.bf16.mxu1 %v3045_v22 }
 0x23a   :  { %903 = vmatpush1.bf16.msra.mxu0 %v3133_v63 }
 0x23b   :  { %904 = vmatprep.subr.bf16.mxu0 %v3150_v9 }
 0x23c   :  { %944 = vmatpush1.bf16.msra.mxu1 %v3047_v23 }
 0x23d   :  { %945 = vmatprep.subr.bf16.mxu1 %v3055_v25 }
 0x23e   :  { %905 = vmatpush1.bf16.msra.mxu0 %v3143_v3 }
 0x23f   :  { %906 = vmatprep.subr.bf16.mxu0 %v3160_v12 }
 0x240   :  { %946 = vmatpush1.bf16.msra.mxu1 %v3057_v26 }
 0x241   :  { %947 = vmatprep.subr.bf16.mxu1 %v3065_v28 }
 0x242   :  { %907 = vmatpush1.bf16.msra.mxu0 %v3153_v10 }
 0x243   :  { %908 = vmatprep.subr.bf16.mxu0 %v3170_v42 }
 0x244   :  { %948 = vmatpush1.bf16.msra.mxu1 %v3067_v29 }
 0x245   :  { %949 = vmatprep.subr.bf16.mxu1 %v3074_v31 }
 0x246   :  { %909 = vmatpush1.bf16.msra.mxu0 %v3163_v39 }
 0x247   :  { %910 = vmatprep.subr.bf16.mxu0 %v3180_v45 }
 0x248   :  { %950 = vmatpush1.bf16.msra.mxu1 %v3076_v32 }
 0x249   :  { %951 = vmatprep.subr.bf16.mxu1 %v3081_v34 }
 0x24a   :  { %911 = vmatpush1.bf16.msra.mxu0 %v3173_v43 }
 0x24b   :  { %2395 = vmatprep.subr.bf16.mxu0 %v4043_v11 }
 0x24c   :  { %952 = vmatpush1.bf16.msra.mxu1 %v3089_v36 }
 0x24d   :  { %929 = vmatmul.mubr.bf16.vlgmr.msra.gmra.mrb[8].mxu0 %v701_v13  ;;  %1072 = vmatprep.subr.bf16.mxu1 %v3191_v47 }
 0x24e   :  { %2396 = vmatpush3.bf16.msra.mxu0 %v3021_v15  ;;  %2411 = vmatprep.mubr.msk.bf16.mxu0 %vm2901_vm3, %v4043_v11  ;;  %v4081_v15 = vld [vmem:[#allocation59_spill] sm:$0xff] }
 0x24f   :  { %2397 = vmatprep.subr.bf16.mxu0 %v4043_v11 }
 0x252   :  { %2398 = vmatpush3.bf16.msra.mxu0 %v3029_v18 }
 0x253   :  { %2399 = vmatprep.subr.bf16.mxu0 %v4043_v11 }
 0x256   :  { %2400 = vmatpush3.bf16.msra.mxu0 %v3041_v21  ;;  %v4079_v21 = vld [vmem:[#allocation58_spill] sm:$0xff] }
 0x257   :  { %2401 = vmatprep.subr.bf16.mxu0 %v4043_v11 }
 0x25a   :  { %2402 = vmatpush3.bf16.msra.mxu0 %v3051_v24 }
 0x25b   :  { %2403 = vmatprep.subr.bf16.mxu0 %v4043_v11 }
 0x25e   :  { %2404 = vmatpush3.bf16.msra.mxu0 %v3061_v27 }
 0x25f   :  { %2405 = vmatprep.subr.bf16.mxu0 %v4043_v11 }
 0x262   :  { %2406 = vmatpush3.bf16.msra.mxu0 %v3071_v30 }
 0x263   :  { %2407 = vmatprep.subr.bf16.mxu0 %v4043_v11 }
 0x266   :  { %2408 = vmatpush3.bf16.msra.mxu0 %v3079_v33 }
 0x267   :  { %2409 = vmatprep.subr.bf16.mxu0 %v4043_v11 }
 0x26a   :  { %2410 = vmatpush3.bf16.msra.mxu0 %v4044_v1 }
 0x26b   :  { %1113 = vmatprep.subr.bf16.mxu0 %v4045_v8  ;;  %v4049_v8 = vld [vmem:[#allocation37_spill] sm:$0xff] }
 0x2bb   :  { %v678_v49 = vpop.xlane.xlu1 %677 }
 0x2bc   :  { %2662 = vrsqrt.f32 %v678_v49  ;;  %v686_v50 = vpop.xlane.xlu0 %685  ;;  %v4048_v49 = vld [vmem:[#allocation36_spill] sm:$0xff] }
 0x2bd   :  { %v687_v51 = vmul.f32 %v4046_v48, %v686_v50  ;;  %v4050_v50 = vld [vmem:[#allocation27_spill] sm:$0xff] }
 0x2c6   :  { %v2663_v41 = vpop.eup %2662 }
 0x2c7   :  { %v691_v53 = vrot.slane %v2663_v41, %v3002_v5  ;;  %v4051_v41 = vld [vmem:[#allocation38_spill] sm:$0xff] }
 0x2c9   :  { %v692_v54 = vmul.f32 %v691_v53, %v687_v51  ;;  %v4052_v51 = vld [vmem:[#allocation39_spill] sm:$0xff]  ;;  %v4053_v53 = vld [vmem:[#allocation40_spill] sm:$0xff] }
 0x2cb   :  { %v693_v56 = vmul.f32 %v692_v54, %v3004_v6  ;;  %v4054_v54 = vld [vmem:[#allocation28_spill] sm:$0xff] }
 0x2cd   :  { %v694_v37 = vrot.slane %v693_v56, 4 }
 0x2cf   :  { %v695_v4 = vadd.f32 %v694_v37, %v693_v56  ;;  %v4055_v56 = vld [vmem:[#allocation41_spill] sm:$0xff]  ;;  %v4056_v37 = vld [vmem:[#allocation42_spill] sm:$0xff] }
 0x2d1   :  { %v696_v52 = vrot.slane %v695_v4, 2 }
 0x2d3   :  { %v697_v13 = vadd.f32 %v696_v52, %v695_v4  ;;  %v4057_v4 = vld [vmem:[#allocation43_spill] sm:$0xff]  ;;  %v4058_v52 = vld [vmem:[#allocation29_spill] sm:$0xff] }
 0x2d5   :  { %v698_v35 = vrot.slane %v697_v13, 1 }
 0x2d7   :  { %v699_v61 = vadd.f32 %v698_v35, %v697_v13  ;;  %v4059_v13 = vld [vmem:[#allocation44_spill] sm:$0xff]  ;;  %v4060_v35 = vld [vmem:[#allocation45_spill] sm:$0xff] }
 0x2d9   :  { %v700_v44 = vpack.c.bf16 %v699_v61, %v699_v61  ;;  %v4061_v61 = vld [vmem:[#allocation46_spill] sm:$0xff] }
 0x2db   :  { %970 = vmatmul.mubr.bf16.vlgmr.msra.gmra.mrb[12].mxu1 %v700_v44  ;;  %2412 = vmatmul.mubr.bf16.vlgmr.msra.gmra.mrb[12].mxu0 %v700_v44  ;;  %v4062_v44 = vld [vmem:[#allocation30_spill] sm:$0xff] }
 0x2dc   :  { %1073 = vmatpush1.bf16.msra.mxu1 %v4047_v0  ;;  %1114 = vmatpush1.bf16.msra.mxu0 %v4048_v49 }
 0x2dd   :  { %1074 = vmatprep.subr.bf16.mxu1 %v4049_v8  ;;  %1115 = vmatprep.subr.bf16.mxu0 %v4050_v50 }
 0x2de   :  { %1104 = vmatprep.mubr.bf16.mxu1 %v4042_v7  ;;  %1145 = vmatprep.mubr.bf16.mxu0 %v4042_v7 }
 0x2e0   :  { %1075 = vmatpush1.bf16.msra.mxu1 %v4051_v41  ;;  %1116 = vmatpush1.bf16.msra.mxu0 %v4052_v51  ;;  %v4063_v51 = vld [vmem:[#allocation47_spill] sm:$0xff] }
 0x2e1   :  { %1076 = vmatprep.subr.bf16.mxu1 %v4053_v53  ;;  %1117 = vmatprep.subr.bf16.mxu0 %v4054_v54  ;;  %v4064_v53 = vld [vmem:[#allocation48_spill] sm:$0xff]  ;;  %v4065_v54 = vld [vmem:[#allocation49_spill] sm:$0xff] }
 0x2e4   :  { %1077 = vmatpush1.bf16.msra.mxu1 %v4055_v56  ;;  %1118 = vmatpush1.bf16.msra.mxu0 %v4056_v37  ;;  %v4066_v56 = vld [vmem:[#allocation31_spill] sm:$0xff]  ;;  %v4067_v37 = vld [vmem:[#allocation50_spill] sm:$0xff] }
 0x2e5   :  { %1078 = vmatprep.subr.bf16.mxu1 %v4057_v4  ;;  %1119 = vmatprep.subr.bf16.mxu0 %v4058_v52  ;;  %v4068_v4 = vld [vmem:[#allocation51_spill] sm:$0xff]  ;;  %v4069_v52 = vld [vmem:[#allocation52_spill] sm:$0xff] }
 0x2e8   :  { %1079 = vmatpush1.bf16.msra.mxu1 %v4059_v13  ;;  %1120 = vmatpush1.bf16.msra.mxu0 %v4060_v35  ;;  %v4070_v13 = vld [vmem:[#allocation32_spill] sm:$0xff]  ;;  %v4071_v35 = vld [vmem:[#allocation53_spill] sm:$0xff] }
 0x2e9   :  { %1080 = vmatprep.subr.bf16.mxu1 %v4061_v61  ;;  %1121 = vmatprep.subr.bf16.mxu0 %v4062_v44  ;;  %v4072_v61 = vld [vmem:[#allocation54_spill] sm:$0xff]  ;;  %v4073_v44 = vld [vmem:[#allocation55_spill] sm:$0xff] }
 0x2ec   :  { %1081 = vmatpush1.bf16.msra.mxu1 %v4063_v51  ;;  %1122 = vmatpush1.bf16.msra.mxu0 %v4064_v53  ;;  %v4074_v51 = vld [vmem:[#allocation33_spill] sm:$0xff]  ;;  %v4075_v53 = vld [vmem:[#allocation56_spill] sm:$0xff] }
 0x2ed   :  { %1082 = vmatprep.subr.bf16.mxu1 %v4065_v54  ;;  %1123 = vmatprep.subr.bf16.mxu0 %v4066_v56  ;;  %v4076_v54 = vld [vmem:[#allocation57_spill] sm:$0xff]  ;;  %v4077_v56 = vld [vmem:[#allocation26_spill] sm:$0xff] }
 0x2f0   :  { %1083 = vmatpush1.bf16.msra.mxu1 %v4067_v37  ;;  %1124 = vmatpush1.bf16.msra.mxu0 %v4068_v4  ;;  %v4078_v37 = vld [vmem:[#allocation14_spill] sm:$0xff] }
 0x2f1   :  { %1084 = vmatprep.subr.bf16.mxu1 %v4069_v52  ;;  %1125 = vmatprep.subr.bf16.mxu0 %v4070_v13 }
 0x2f4   :  { %1085 = vmatpush1.bf16.msra.mxu1 %v4071_v35  ;;  %1126 = vmatpush1.bf16.msra.mxu0 %v4072_v61 }
 0x2f5   :  { %1086 = vmatprep.subr.bf16.mxu1 %v4073_v44  ;;  %1127 = vmatprep.subr.bf16.mxu0 %v4074_v51 }
 0x2f8   :  { %1087 = vmatpush1.bf16.msra.mxu1 %v4075_v53  ;;  %1128 = vmatpush1.bf16.msra.mxu0 %v4076_v54 }
 0x2f9   :  { %1154 = vmatprep.subr.bf16.mxu1 %v4077_v56  ;;  %1195 = vmatprep.subr.bf16.mxu0 %v4078_v37 }
 0x300   :  { %v848_v4 = vpop.f32.mrb[4].mxu0  ;;  %v889_v52 = vpop.f32.mrb[8].mxu1 }
 0x301   :  { %v850_v41 = vpop.f32.mrb[5].mxu0  ;;  %v891_v13 = vpop.f32.mrb[9].mxu1 }
 0x302   :  { %v852_v50 = vpop.f32.mrb[6].mxu0  ;;  %v893_v35 = vpop.f32.mrb[10].mxu1  ;;  %v1021_v24 = vadd.f32 %v891_v13, %v3281_v55 }
 0x303   :  { %v853_v8 = vpop.f32.mrb[7].mxu0  ;;  %v894_v61 = vpop.f32.mrb[11].mxu1 }
 0x304   :  { %v4080_v61 = vld [vmem:[#allocation60_spill] sm:$0xff] }
 0x320   :  { %v930_v49 = vpop.f32.mrb[8].mxu0 }
 0x321   :  { %v932_v44 = vpop.f32.mrb[9].mxu0  ;;  %v1022_v18 = vadd.f32 %v930_v49, %v4080_v61 }
 0x322   :  { %v934_v0 = vpop.f32.mrb[10].mxu0 }
 0x323   :  { %v935_v51 = vpop.f32.mrb[11].mxu0 }
 0x3ae   :  { %v971_v48 = vpop.f32.mrb[12].mxu1  ;;  %v1012_v53 = vpop.f32.mrb[12].mxu0 }
 0x3af   :  { %v972_v1 = vadd.f32 %v971_v48, %v848_v4  ;;  %v1013_v54 = vadd.f32 %v1012_v53, %v889_v52  ;;  %v973_v33 = vpop.f32.mrb[13].mxu1  ;;  %v2413_v56 = vpop.f32.mrb[13].mxu0 }
 0x3b0   :  { %v974_v30 = vadd.f32 %v973_v33, %v850_v41  ;;  %v975_v37 = vpop.f32.mrb[14].mxu1  ;;  %v1015_v27 = vpop.f32.mrb[14].mxu0  ;;  %v1023_v56 = vadd.f32 %v932_v44, %v3293_v46 }
 0x3b1   :  { %v1018_v50 = vadd.f32 %v972_v1, %v4079_v21  ;;  %v976_v35 = vpop.f32.mrb[15].mxu1  ;;  %v2414_v8 = vpop.f32.mrb[15].mxu0  ;;  %v1020_v4 = vadd.f32 %v1013_v54, %v3295_v58 }
 0x3b2   :  { %v1019_v0 = vadd.f32 %v974_v30, %v4081_v15 }
 0x3b3   :  { %v1024_v51 = vadd.f32 %v1021_v24, %v1018_v50 }
 0x3b4   :  { %v1031_v47 = vadd.f32 %v1022_v18, %v1019_v0  ;;  %v3470_v0 = vld [vmem:[#allocation2] sm:$0xff] }
 0x3b5   :  { %v2265_v36 = vmul.f32 -1.442695, %v1024_v51 }
 0x3b6   :  { %v2266_v48 = vmul.f32 -1.442695, %v1031_v47 }
 0x3b7   :  { %2664 = vpow2.f32 %v2265_v36 }
 0x3b8   :  { %2666 = vpow2.f32 %v2266_v48 }
 0x3c1   :  { %v2665_v53 = vpop.eup %2664 }
 0x3c2   :  { %v1028_v33 = vadd.f32 1.0, %v2665_v53  ;;  %v2667_v27 = vpop.eup %2666 }
 0x3c3   :  { %v1035_v41 = vadd.f32 1.0, %v2667_v27 }
 0x3c4   :  { %2668 = vrcp.f32 %v1028_v33 }
 0x3c5   :  { %2670 = vrcp.f32 %v1035_v41 }
 0x3ce   :  { %v2669_v1 = vpop.eup %2668 }
 0x3cf   :  { %v1038_v52 = vmul.f32 %v2669_v1, %v1023_v56  ;;  %v2671_v24 = vpop.eup %2670 }
 0x3d0   :  { %v1041_v18 = vsub.f32 1.0, %v2671_v24  ;;  %v1043_v47 = vmul.f32 %v2671_v24, %v3300_v40  ;;  %v4097_v24 = vld [vmem:[#allocation27_spill] sm:$0xff] }
 0x3d1   :  { %v1039_v49 = vadd.f32 %v1038_v52, %v1020_v4  ;;  %v4094_v4 = vld [vmem:[#allocation35_spill] sm:$0xff]  ;;  %v4095_v52 = vld [vmem:[#allocation36_spill] sm:$0xff] }
 0x3d3   :  { %2672 = vtanh.f32 %v1039_v49  ;;  %v4096_v49 = vld [vmem:[#allocation37_spill] sm:$0xff] }
 0x3dd   :  { %v2673_v30 = vpop.eup %2672 }
 0x3de   :  { %v1042_v36 = vmul.f32 %v2673_v30, %v1041_v18  ;;  %v4098_v18 = vld [vmem:[#allocation38_spill] sm:$0xff]  ;;  %v4099_v30 = vld [vmem:[#allocation39_spill] sm:$0xff] }
 0x3e0   :  { %v3406_v13 = vadd.f32 %v1043_v47, %v1042_v36  ;;  %v4100_v36 = vld [vmem:[#allocation40_spill] sm:$0xff] }
 0x3e1   :  { %v4101_v47 = vld [vmem:[#allocation28_spill] sm:$0xff] }
 0x3e2   :  { %v1071_v37 = vpack.c.bf16 %v3406_v13, %v3406_v13  ;;  %v1045_v44 = vmul.f32 %v3406_v13, %v3406_v13  ;;  %v1053_v54 = vrot.slane %v3406_v13, %v3002_v5 }
 0x3e4   :  { %1105 = vmatmul.mubr.bf16.vlgmr.msra.gmra.mrb[16].mxu1 %v1071_v37  ;;  %1146 = vmatmul.mubr.bf16.vlgmr.msra.gmra.mrb[16].mxu0 %v1071_v37  ;;  %v1046_v50 = vsel %vm176_vm2, %v1045_v44, 0.0  ;;  %v1054_v35 = vmul.f32 %v1053_v54, %v3004_v6  ;;  %v4082_v6 = vld [vmem:[#allocation22_spill] sm:$0xff]  ;;  %v4104_v54 = vld [vmem:[#allocation43_spill] sm:$0xff] }
 0x3e5   :  { %1155 = vmatpush1.bf16.msra.mxu1 %v3095_v38  ;;  %1047 = vadd.xlane.f32.xlu1 %v1046_v50  ;;  %v4103_v44 = vld [vmem:[#allocation42_spill] sm:$0xff]  ;;  %v4105_v50 = vld [vmem:[#allocation29_spill] sm:$0xff] }
 0x3e6   :  { %1055 = vadd.xlane.f32.xlu0 %v1054_v35  ;;  %1156 = vmatprep.subr.bf16.mxu1 %v3117_v59  ;;  %v4106_v35 = vld [vmem:[#allocation44_spill] sm:$0xff] }
 0x3e7   :  { %1186 = vmatprep.mubr.bf16.mxu1 %v4042_v7  ;;  %1196 = vmatpush1.bf16.msra.mxu0 %v3018_v14  ;;  %v4083_v14 = vld [vmem:[#allocation34_spill] sm:$0xff] }
 0x3e8   :  { %1197 = vmatprep.subr.bf16.mxu0 %v3025_v16  ;;  %1227 = vmatprep.mubr.bf16.mxu0 %v4042_v7  ;;  %v4084_v16 = vld [vmem:[#allocation15_spill] sm:$0xff] }
 0x3e9   :  { %1157 = vmatpush1.bf16.msra.mxu1 %v3111_v57 }
 0x3ea   :  { %1158 = vmatprep.subr.bf16.mxu1 %v3130_v62 }
 0x3eb   :  { %1198 = vmatpush1.bf16.msra.mxu0 %v3027_v17  ;;  %v4085_v17 = vld [vmem:[#allocation16_spill] sm:$0xff] }
 0x3ec   :  { %1199 = vmatprep.subr.bf16.mxu0 %v3032_v19  ;;  %v4086_v19 = vld [vmem:[#allocation17_spill] sm:$0xff] }
 0x3ed   :  { %1159 = vmatpush1.bf16.msra.mxu1 %v3120_v60 }
 0x3ee   :  { %1160 = vmatprep.subr.bf16.mxu1 %v3140_v2 }
 0x3ef   :  { %1200 = vmatpush1.bf16.msra.mxu0 %v3038_v20  ;;  %v4087_v20 = vld [vmem:[#allocation18_spill] sm:$0xff] }
 0x3f0   :  { %1201 = vmatprep.subr.bf16.mxu0 %v3045_v22  ;;  %v4088_v22 = vld [vmem:[#allocation19_spill] sm:$0xff] }
 0x3f1   :  { %1161 = vmatpush1.bf16.msra.mxu1 %v3133_v63 }
 0x3f2   :  { %1162 = vmatprep.subr.bf16.mxu1 %v3150_v9 }
 0x3f3   :  { %1202 = vmatpush1.bf16.msra.mxu0 %v3047_v23  ;;  %v4089_v23 = vld [vmem:[#allocation20_spill] sm:$0xff] }
 0x3f4   :  { %1203 = vmatprep.subr.bf16.mxu0 %v3055_v25  ;;  %v4090_v25 = vld [vmem:[#allocation21_spill] sm:$0xff] }
 0x3f5   :  { %1163 = vmatpush1.bf16.msra.mxu1 %v3143_v3 }
 0x3f6   :  { %1164 = vmatprep.subr.bf16.mxu1 %v3160_v12 }
 0x3f7   :  { %1204 = vmatpush1.bf16.msra.mxu0 %v3057_v26  ;;  %v4091_v26 = vld [vmem:[#allocation23_spill] sm:$0xff] }
 0x3f8   :  { %1205 = vmatprep.subr.bf16.mxu0 %v3065_v28  ;;  %v4092_v28 = vld [vmem:[#allocation25_spill] sm:$0xff] }
 0x3f9   :  { %1165 = vmatpush1.bf16.msra.mxu1 %v3153_v10 }
 0x3fa   :  { %1166 = vmatprep.subr.bf16.mxu1 %v3170_v42 }
 0x3fb   :  { %1206 = vmatpush1.bf16.msra.mxu0 %v3067_v29 }
 0x3fc   :  { %1207 = vmatprep.subr.bf16.mxu0 %v3074_v31 }
 0x3fd   :  { %1167 = vmatpush1.bf16.msra.mxu1 %v3163_v39 }
 0x3fe   :  { %1168 = vmatprep.subr.bf16.mxu1 %v3180_v45 }
 0x3ff   :  { %1208 = vmatpush1.bf16.msra.mxu0 %v3076_v32 }
 0x400   :  { %1209 = vmatprep.subr.bf16.mxu0 %v3081_v34  ;;  %v4093_v34 = vld [vmem:[#allocation24_spill] sm:$0xff] }
 0x401   :  { %1169 = vmatpush1.bf16.msra.mxu1 %v3173_v43 }
 0x402   :  { %2415 = vmatprep.subr.bf16.mxu1 %v4043_v11 }
 0x403   :  { %1210 = vmatpush1.bf16.msra.mxu0 %v4082_v6  ;;  %v4107_v6 = vld [vmem:[#allocation45_spill] sm:$0xff] }
 0x404   :  { %1187 = vmatmul.mubr.bf16.vlgmr.msra.gmra.mrb[20].mxu1 %v1071_v37  ;;  %1330 = vmatprep.subr.bf16.mxu0 %v4083_v14  ;;  %v4102_v37 = vld [vmem:[#allocation41_spill] sm:$0xff] }
 0x405   :  { %2416 = vmatpush3.bf16.msra.mxu1 %v4084_v16  ;;  %2431 = vmatprep.mubr.msk.bf16.mxu1 %vm2901_vm3, %v4043_v11  ;;  %v4108_v16 = vld [vmem:[#allocation46_spill] sm:$0xff] }
 0x406   :  { %2417 = vmatprep.subr.bf16.mxu1 %v4043_v11 }
 0x409   :  { %2418 = vmatpush3.bf16.msra.mxu1 %v4085_v17  ;;  %v4109_v17 = vld [vmem:[#allocation30_spill] sm:$0xff] }
 0x40a   :  { %2419 = vmatprep.subr.bf16.mxu1 %v4043_v11 }
 0x40d   :  { %2420 = vmatpush3.bf16.msra.mxu1 %v4086_v19  ;;  %v4110_v19 = vld [vmem:[#allocation47_spill] sm:$0xff] }
 0x40e   :  { %2421 = vmatprep.subr.bf16.mxu1 %v4043_v11 }
 0x411   :  { %2422 = vmatpush3.bf16.msra.mxu1 %v4087_v20  ;;  %v4111_v20 = vld [vmem:[#allocation48_spill] sm:$0xff] }
 0x412   :  { %2423 = vmatprep.subr.bf16.mxu1 %v4043_v11 }
 0x415   :  { %2424 = vmatpush3.bf16.msra.mxu1 %v4088_v22  ;;  %v4112_v22 = vld [vmem:[#allocation49_spill] sm:$0xff] }
 0x416   :  { %2425 = vmatprep.subr.bf16.mxu1 %v4043_v11 }
 0x419   :  { %2426 = vmatpush3.bf16.msra.mxu1 %v4089_v23  ;;  %v4113_v23 = vld [vmem:[#allocation31_spill] sm:$0xff] }
 0x41a   :  { %2427 = vmatprep.subr.bf16.mxu1 %v4043_v11 }
 0x41d   :  { %2428 = vmatpush3.bf16.msra.mxu1 %v4090_v25  ;;  %v4114_v25 = vld [vmem:[#allocation50_spill] sm:$0xff] }
 0x41e   :  { %2429 = vmatprep.subr.bf16.mxu1 %v4043_v11 }
 0x421   :  { %2430 = vmatpush3.bf16.msra.mxu1 %v4091_v26  ;;  %v4115_v26 = vld [vmem:[#allocation51_spill] sm:$0xff] }
 0x422   :  { %1371 = vmatprep.subr.bf16.mxu1 %v4092_v28  ;;  %v4116_v28 = vld [vmem:[#allocation52_spill] sm:$0xff] }
 0x472   :  { %v1048_v29 = vpop.xlane.xlu1 %1047 }
 0x473   :  { %2674 = vrsqrt.f32 %v1048_v29  ;;  %v1056_v31 = vpop.xlane.xlu0 %1055  ;;  %v4117_v29 = vld [vmem:[#allocation32_spill] sm:$0xff] }
 0x474   :  { %v1057_v38 = vmul.f32 %v4093_v34, %v1056_v31  ;;  %v4118_v31 = vld [vmem:[#allocation53_spill] sm:$0xff] }
 0x47d   :  { %v2675_v32 = vpop.eup %2674 }
 0x47e   :  { %v1061_v40 = vrot.slane %v2675_v32, %v3002_v5  ;;  %v4119_v32 = vld [vmem:[#allocation54_spill] sm:$0xff] }
 0x480   :  { %v1062_v8 = vmul.f32 %v1061_v40, %v1057_v38  ;;  %v4120_v38 = vld [vmem:[#allocation55_spill] sm:$0xff]  ;;  %v4121_v40 = vld [vmem:[#allocation33_spill] sm:$0xff] }
 0x482   :  { %v1063_v51 = vmul.f32 %v3470_v0, %v1062_v8  ;;  %v4122_v8 = vld [vmem:[#allocation56_spill] sm:$0xff] }
 0x484   :  { %v1064_v48 = vrot.slane %v1063_v51, 4 }
 0x486   :  { %v1065_v53 = vadd.f32 %v1064_v48, %v1063_v51  ;;  %v4123_v51 = vld [vmem:[#allocation57_spill] sm:$0xff]  ;;  %v4124_v48 = vld [vmem:[#allocation26_spill] sm:$0xff] }
 0x488   :  { %v1066_v33 = vrot.slane %v1065_v53, 2 }
 0x48a   :  { %v1067_v27 = vadd.f32 %v1066_v33, %v1065_v53  ;;  %v3506_v53 = vld [vmem:[#allocation4 + $0x4] ss:$12 sps:$4 sm:$0xff]  }
 0x48b   :  { %4125 = vst [vmem:[#allocation14_spill] sm:$0xff] %v3506_v53 }
 0x48c   :  { %v1068_v41 = vrot.slane %v1067_v27, 1 }
 0x48e   :  { %v1069_v56 = vadd.f32 %v1068_v41, %v1067_v27 }
 0x490   :  { %v1070_v1 = vpack.c.bf16 %v1069_v56, %v1069_v56 }
 0x492   :  { %1228 = vmatmul.mubr.bf16.vlgmr.msra.gmra.mrb[20].mxu0 %v1070_v1  ;;  %2432 = vmatmul.mubr.bf16.vlgmr.msra.gmra.mrb[24].mxu1 %v1070_v1 }
 0x493   :  { %1331 = vmatpush1.bf16.msra.mxu0 %v4094_v4  ;;  %1372 = vmatpush1.bf16.msra.mxu1 %v4095_v52 }
 0x494   :  { %1332 = vmatprep.subr.bf16.mxu0 %v4096_v49  ;;  %1373 = vmatprep.subr.bf16.mxu1 %v4097_v24 }
 0x495   :  { %1362 = vmatprep.mubr.bf16.mxu0 %v4042_v7  ;;  %1403 = vmatprep.mubr.bf16.mxu1 %v4042_v7 }
 0x497   :  { %1333 = vmatpush1.bf16.msra.mxu0 %v4098_v18  ;;  %1374 = vmatpush1.bf16.msra.mxu1 %v4099_v30 }
 0x498   :  { %1334 = vmatprep.subr.bf16.mxu0 %v4100_v36  ;;  %1375 = vmatprep.subr.bf16.mxu1 %v4101_v47 }
 0x49b   :  { %1335 = vmatpush1.bf16.msra.mxu0 %v4102_v37  ;;  %1376 = vmatpush1.bf16.msra.mxu1 %v4103_v44 }
 0x49c   :  { %1336 = vmatprep.subr.bf16.mxu0 %v4104_v54  ;;  %1377 = vmatprep.subr.bf16.mxu1 %v4105_v50 }
 0x49f   :  { %1337 = vmatpush1.bf16.msra.mxu0 %v4106_v35  ;;  %1378 = vmatpush1.bf16.msra.mxu1 %v4107_v6 }
 0x4a0   :  { %1338 = vmatprep.subr.bf16.mxu0 %v4108_v16  ;;  %1379 = vmatprep.subr.bf16.mxu1 %v4109_v17 }
 0x4a3   :  { %1339 = vmatpush1.bf16.msra.mxu0 %v4110_v19  ;;  %1380 = vmatpush1.bf16.msra.mxu1 %v4111_v20 }
 0x4a4   :  { %1340 = vmatprep.subr.bf16.mxu0 %v4112_v22  ;;  %1381 = vmatprep.subr.bf16.mxu1 %v4113_v23 }
 0x4a7   :  { %1341 = vmatpush1.bf16.msra.mxu0 %v4114_v25  ;;  %1382 = vmatpush1.bf16.msra.mxu1 %v4115_v26 }
 0x4a8   :  { %1342 = vmatprep.subr.bf16.mxu0 %v4116_v28  ;;  %1383 = vmatprep.subr.bf16.mxu1 %v4117_v29 }
 0x4ab   :  { %1343 = vmatpush1.bf16.msra.mxu0 %v4118_v31  ;;  %1384 = vmatpush1.bf16.msra.mxu1 %v4119_v32 }
 0x4ac   :  { %1344 = vmatprep.subr.bf16.mxu0 %v4120_v38  ;;  %1385 = vmatprep.subr.bf16.mxu1 %v4121_v40 }
 0x4af   :  { %1345 = vmatpush1.bf16.msra.mxu0 %v4122_v8  ;;  %1386 = vmatpush1.bf16.msra.mxu1 %v4123_v51 }
 0x4b0   :  { %1412 = vmatprep.subr.bf16.mxu0 %v4124_v48  ;;  %1453 = vmatprep.subr.bf16.mxu1 %v3506_v53 }
 0x4b7   :  { %v1106_v33 = vpop.f32.mrb[16].mxu1  ;;  %v1147_v27 = vpop.f32.mrb[16].mxu0 }
 0x4b8   :  { %v1108_v41 = vpop.f32.mrb[17].mxu1  ;;  %v1149_v56 = vpop.f32.mrb[17].mxu0 }
 0x4b9   :  { %v1110_v1 = vpop.f32.mrb[18].mxu1  ;;  %v1151_v24 = vpop.f32.mrb[18].mxu0  ;;  %v1279_v25 = vadd.f32 %v1149_v56, %v3281_v55 }
 0x4ba   :  { %v1111_v47 = vpop.f32.mrb[19].mxu1  ;;  %v1152_v50 = vpop.f32.mrb[19].mxu0 }
 0x4d7   :  { %v1188_v17 = vpop.f32.mrb[20].mxu1 }
 0x4d8   :  { %v1190_v23 = vpop.f32.mrb[21].mxu1  ;;  %v1280_v50 = vadd.f32 %v1188_v17, %v4080_v61 }
 0x4d9   :  { %v1192_v29 = vpop.f32.mrb[22].mxu1 }
 0x4da   :  { %v1193_v40 = vpop.f32.mrb[23].mxu1 }
 0x565   :  { %v1229_v8 = vpop.f32.mrb[20].mxu0  ;;  %v1270_v51 = vpop.f32.mrb[24].mxu1 }
 0x566   :  { %v1230_v38 = vadd.f32 %v1229_v8, %v1106_v33  ;;  %v1271_v48 = vadd.f32 %v1270_v51, %v1147_v27  ;;  %v1231_v32 = vpop.f32.mrb[21].mxu0  ;;  %v2433_v31 = vpop.f32.mrb[25].mxu1 }
 0x567   :  { %v1232_v28 = vadd.f32 %v1231_v32, %v1108_v41  ;;  %v1233_v53 = vpop.f32.mrb[22].mxu0  ;;  %v1273_v26 = vpop.f32.mrb[26].mxu1 }
 0x568   :  { %v1276_v1 = vadd.f32 %v1230_v38, %v4079_v21  ;;  %v1234_v24 = vpop.f32.mrb[23].mxu0  ;;  %v2434_v47 = vpop.f32.mrb[27].mxu1  ;;  %v1281_v53 = vadd.f32 %v1190_v23, %v3293_v46  ;;  %v1278_v33 = vadd.f32 %v1271_v48, %v3295_v58 }
 0x569   :  { %v1277_v29 = vadd.f32 %v1232_v28, %v4081_v15 }
 0x56a   :  { %v1282_v40 = vadd.f32 %v1279_v25, %v1276_v1 }
 0x56b   :  { %v1289_v22 = vadd.f32 %v1280_v50, %v1277_v29  ;;  %v3526_v50 = vld [vmem:[#allocation6 + $0x10] ss:$24 sps:$4 sm:$0xff]  }
 0x56c   :  { %v2267_v20 = vmul.f32 -1.442695, %v1282_v40  ;;  %v3534_v29 = vld [vmem:[#allocation4 + $0x1c] ss:$12 sps:$4 sm:$0xff]   ;;  %v3540_v40 = vld [vmem:[#allocation4 + $0x18] ss:$12 sps:$4 sm:$0xff]  }
 0x56d   :  { %v2268_v8 = vmul.f32 -1.442695, %v1289_v22 }
 0x56e   :  { %2676 = vpow2.f32 %v2267_v20 }
 0x56f   :  { %2678 = vpow2.f32 %v2268_v8  ;;  %v3548_v8 = vld [vmem:[#allocation4 + $0x30] ss:$12 sps:$4 sm:$0xff]  }
 0x578   :  { %v2677_v31 = vpop.eup %2676 }
 0x579   :  { %v1286_v32 = vadd.f32 1.0, %v2677_v31  ;;  %v2679_v26 = vpop.eup %2678  ;;  %v3551_v31 = vld [vmem:[#allocation4 + $0x4c] ss:$12 sps:$4 sm:$0xff]  }
 0x57a   :  { %v1293_v51 = vadd.f32 1.0, %v2679_v26  ;;  %v3618_v26 = vld [vmem:[#allocation4 + $0x98] ss:$12 sps:$4 sm:$0xff]  }
 0x57b   :  { %2680 = vrcp.f32 %v1286_v32  ;;  %v3614_v32 = vld [vmem:[#allocation4 + $0x80] ss:$12 sps:$4 sm:$0xff]   ;;  %4133 = vst [vmem:[#allocation17_spill] sm:$0xff] %v3618_v26 }
 0x57c   :  { %2682 = vrcp.f32 %v1293_v51  ;;  %4132 = vst [vmem:[#allocation16_spill] sm:$0xff] %v3614_v32  ;;  %v3622_v51 = vld [vmem:[#allocation4 + $0xb0] ss:$12 sps:$4 sm:$0xff]  }
 0x57d   :  { %4134 = vst [vmem:[#allocation18_spill] sm:$0xff] %v3622_v51 }
 0x585   :  { %v2681_v38 = vpop.eup %2680 }
 0x586   :  { %v1296_v27 = vmul.f32 %v2681_v38, %v1281_v53  ;;  %v2683_v25 = vpop.eup %2682  ;;  %v3625_v53 = vld [vmem:[#allocation6 + $0xc] ss:$24 sps:$4 sm:$0xff]  }
 0x587   :  { %v1299_v28 = vsub.f32 1.0, %v2683_v25  ;;  %v1301_v22 = vmul.f32 %v2683_v25, %v3406_v13  ;;  %v3531_v13 = vld [vmem:[#allocation4] ss:$12 sps:$4 sm:$0xff]  }
 0x588   :  { %v1297_v41 = vadd.f32 %v1296_v27, %v1278_v33 }
 0x58a   :  { %2684 = vtanh.f32 %v1297_v41 }
 0x594   :  { %v2685_v56 = vpop.eup %2684 }
 0x595   :  { %v1300_v20 = vmul.f32 %v2685_v56, %v1299_v28 }
 0x597   :  { %v3516_v17 = vadd.f32 %v1301_v22, %v1300_v20 }
 0x599   :  { %v1329_v1 = vpack.c.bf16 %v3516_v17, %v3516_v17  ;;  %v1303_v23 = vmul.f32 %v3516_v17, %v3516_v17  ;;  %v1311_v48 = vrot.slane %v3516_v17, %v3002_v5 }
 0x59b   :  { %1363 = vmatmul.mubr.bf16.vlgmr.msra.gmra.mrb[24].mxu0 %v1329_v1  ;;  %1404 = vmatmul.mubr.bf16.vlgmr.msra.gmra.mrb[28].mxu1 %v1329_v1  ;;  %v1304_v24 = vsel %vm176_vm2, %v1303_v23, 0.0  ;;  %v1312_v47 = vmul.f32 %v3470_v0, %v1311_v48 }
 0x59c   :  { %1413 = vmatpush1.bf16.msra.mxu0 %v3526_v50  ;;  %1305 = vadd.xlane.f32.xlu1 %v1304_v24 }
 0x59d   :  { %1313 = vadd.xlane.f32.xlu0 %v1312_v47  ;;  %1414 = vmatprep.subr.bf16.mxu0 %v3117_v59  ;;  %v3543_v59 = vld [vmem:[#allocation4 + $0x34] ss:$12 sps:$4 sm:$0xff]  }
 0x59e   :  { %1444 = vmatprep.mubr.bf16.mxu0 %v4042_v7  ;;  %1454 = vmatpush1.bf16.msra.mxu1 %v3531_v13 }
 0x59f   :  { %1455 = vmatprep.subr.bf16.mxu1 %v3534_v29  ;;  %1485 = vmatprep.mubr.bf16.mxu1 %v4042_v7 }
 0x5a0   :  { %1415 = vmatpush1.bf16.msra.mxu0 %v3111_v57  ;;  %v3556_v57 = vld [vmem:[#allocation4 + $0x48] ss:$12 sps:$4 sm:$0xff]  }
 0x5a1   :  { %1416 = vmatprep.subr.bf16.mxu0 %v3130_v62  ;;  %v3559_v62 = vld [vmem:[#allocation4 + $0x64] ss:$12 sps:$4 sm:$0xff]  }
 0x5a2   :  { %1456 = vmatpush1.bf16.msra.mxu1 %v3540_v40 }
 0x5a3   :  { %1457 = vmatprep.subr.bf16.mxu1 %v3543_v59 }
 0x5a4   :  { %1417 = vmatpush1.bf16.msra.mxu0 %v3120_v60  ;;  %v3564_v60 = vld [vmem:[#allocation4 + $0x60] ss:$12 sps:$4 sm:$0xff]  }
 0x5a5   :  { %1418 = vmatprep.subr.bf16.mxu0 %v3140_v2  ;;  %v3567_v2 = vld [vmem:[#allocation4 + $0x7c] ss:$12 sps:$4 sm:$0xff]  }
 0x5a6   :  { %1458 = vmatpush1.bf16.msra.mxu1 %v3548_v8 }
 0x5a7   :  { %1459 = vmatprep.subr.bf16.mxu1 %v3551_v31 }
 0x5a8   :  { %1419 = vmatpush1.bf16.msra.mxu0 %v3133_v63  ;;  %v3572_v63 = vld [vmem:[#allocation4 + $0x78] ss:$12 sps:$4 sm:$0xff]  }
 0x5a9   :  { %1420 = vmatprep.subr.bf16.mxu0 %v3150_v9  ;;  %v3575_v9 = vld [vmem:[#allocation4 + $0x94] ss:$12 sps:$4 sm:$0xff]  }
 0x5aa   :  { %1460 = vmatpush1.bf16.msra.mxu1 %v3556_v57 }
 0x5ab   :  { %1461 = vmatprep.subr.bf16.mxu1 %v3559_v62 }
 0x5ac   :  { %1421 = vmatpush1.bf16.msra.mxu0 %v3143_v3  ;;  %v3580_v3 = vld [vmem:[#allocation4 + $0x90] ss:$12 sps:$4 sm:$0xff]  }
 0x5ad   :  { %1422 = vmatprep.subr.bf16.mxu0 %v3160_v12  ;;  %v3583_v12 = vld [vmem:[#allocation4 + $0xac] ss:$12 sps:$4 sm:$0xff]  }
 0x5ae   :  { %1462 = vmatpush1.bf16.msra.mxu1 %v3564_v60 }
 0x5af   :  { %1463 = vmatprep.subr.bf16.mxu1 %v3567_v2 }
 0x5b0   :  { %1423 = vmatpush1.bf16.msra.mxu0 %v3153_v10  ;;  %v3588_v10 = vld [vmem:[#allocation4 + $0xa8] ss:$12 sps:$4 sm:$0xff]  }
 0x5b1   :  { %1424 = vmatprep.subr.bf16.mxu0 %v3170_v42  ;;  %4126 = vst [vmem:[#allocation58_spill] sm:$0xff] %v3588_v10  ;;  %v3598_v42 = vld [vmem:[#allocation4 + $0x20] ss:$12 sps:$4 sm:$0xff]  }
 0x5b2   :  { %1464 = vmatpush1.bf16.msra.mxu1 %v3572_v63  ;;  %4128 = vst [vmem:[#allocation59_spill] sm:$0xff] %v3598_v42 }
 0x5b3   :  { %1465 = vmatprep.subr.bf16.mxu1 %v3575_v9 }
 0x5b4   :  { %1425 = vmatpush1.bf16.msra.mxu0 %v3163_v39  ;;  %v3592_v39 = vld [vmem:[#allocation4 + $0x8] ss:$12 sps:$4 sm:$0xff]  }
 0x5b5   :  { %1426 = vmatprep.subr.bf16.mxu0 %v3180_v45  ;;  %4127 = vst [vmem:[#allocation60_spill] sm:$0xff] %v3592_v39  ;;  %v3606_v45 = vld [vmem:[#allocation4 + $0x50] ss:$12 sps:$4 sm:$0xff]  }
 0x5b6   :  { %1466 = vmatpush1.bf16.msra.mxu1 %v3580_v3  ;;  %4130 = vst [vmem:[#allocation34_spill] sm:$0xff] %v3606_v45 }
 0x5b7   :  { %1467 = vmatprep.subr.bf16.mxu1 %v3583_v12 }
 0x5b8   :  { %1427 = vmatpush1.bf16.msra.mxu0 %v3173_v43  ;;  %v3602_v43 = vld [vmem:[#allocation4 + $0x38] ss:$12 sps:$4 sm:$0xff]  }
 0x5b9   :  { %2435 = vmatprep.subr.bf16.mxu0 %v4043_v11  ;;  %4129 = vst [vmem:[#allocation22_spill] sm:$0xff] %v3602_v43 }
 0x5ba   :  { %1468 = vmatpush1.bf16.msra.mxu1 %v3588_v10 }
 0x5bb   :  { %1445 = vmatmul.mubr.bf16.vlgmr.msra.gmra.mrb[28].mxu0 %v1329_v1  ;;  %1588 = vmatprep.subr.bf16.mxu1 %v4083_v14  ;;  %v3610_v14 = vld [vmem:[#allocation4 + $0x68] ss:$12 sps:$4 sm:$0xff]  }
 0x5bc   :  { %2436 = vmatpush3.bf16.msra.mxu0 %v3592_v39  ;;  %2451 = vmatprep.mubr.msk.bf16.mxu0 %vm2901_vm3, %v4043_v11  ;;  %4131 = vst [vmem:[#allocation15_spill] sm:$0xff] %v3610_v14 }
 0x5bd   :  { %2437 = vmatprep.subr.bf16.mxu0 %v4043_v11 }
 0x5c0   :  { %2438 = vmatpush3.bf16.msra.mxu0 %v3598_v42 }
 0x5c1   :  { %2439 = vmatprep.subr.bf16.mxu0 %v4043_v11 }
 0x5c4   :  { %2440 = vmatpush3.bf16.msra.mxu0 %v3602_v43 }
 0x5c5   :  { %2441 = vmatprep.subr.bf16.mxu0 %v4043_v11 }
 0x5c8   :  { %2442 = vmatpush3.bf16.msra.mxu0 %v3606_v45 }
 0x5c9   :  { %2443 = vmatprep.subr.bf16.mxu0 %v4043_v11 }
 0x5cc   :  { %2444 = vmatpush3.bf16.msra.mxu0 %v3610_v14 }
 0x5cd   :  { %2445 = vmatprep.subr.bf16.mxu0 %v4043_v11 }
 0x5d0   :  { %2446 = vmatpush3.bf16.msra.mxu0 %v3614_v32 }
 0x5d1   :  { %2447 = vmatprep.subr.bf16.mxu0 %v4043_v11 }
 0x5d4   :  { %2448 = vmatpush3.bf16.msra.mxu0 %v3618_v26 }
 0x5d5   :  { %2449 = vmatprep.subr.bf16.mxu0 %v4043_v11 }
 0x5d8   :  { %2450 = vmatpush3.bf16.msra.mxu0 %v3622_v51 }
 0x5d9   :  { %1629 = vmatprep.subr.bf16.mxu0 %v3625_v53 }
 0x629   :  { %v1306_v38 = vpop.xlane.xlu1 %1305 }
 0x62a   :  { %2686 = vrsqrt.f32 %v1306_v38  ;;  %v1314_v33 = vpop.xlane.xlu0 %1313  ;;  %v3634_v38 = vld [vmem:[#allocation6 + $0x3c] ss:$24 sps:$4 sm:$0xff]  }
 0x62b   :  { %v1315_v41 = vmul.f32 %v4093_v34, %v1314_v33  ;;  %v3642_v33 = vld [vmem:[#allocation6 + $0x6c] ss:$24 sps:$4 sm:$0xff]  }
 0x634   :  { %v2687_v27 = vpop.eup %2686 }
 0x635   :  { %v1319_v25 = vrot.slane %v2687_v27, %v3002_v5  ;;  %v4147_v27 = vld [vmem:[#allocation56_spill] sm:$0xff] }
 0x637   :  { %v1320_v28 = vmul.f32 %v1319_v25, %v1315_v41  ;;  %v4148_v41 = vld [vmem:[#allocation57_spill] sm:$0xff]  ;;  %v3677_v25 = vld [vmem:[#allocation6 + $0x14] ss:$24 sps:$4 sm:$0xff]  }
 0x638   :  { %4149 = vst [vmem:[#allocation25_spill] sm:$0xff] %v3677_v25 }
 0x639   :  { %v1321_v56 = vmul.f32 %v3470_v0, %v1320_v28  ;;  %v4150_v28 = vld [vmem:[#allocation14_spill] sm:$0xff] }
 0x63b   :  { %v1322_v20 = vrot.slane %v1321_v56, 4 }
 0x63d   :  { %v1323_v22 = vadd.f32 %v1322_v20, %v1321_v56 }
 0x63f   :  { %v1324_v1 = vrot.slane %v1323_v22, 2 }
 0x641   :  { %v1325_v23 = vadd.f32 %v1324_v1, %v1323_v22 }
 0x643   :  { %v1326_v48 = vrot.slane %v1325_v23, 1 }
 0x645   :  { %v1327_v24 = vadd.f32 %v1326_v48, %v1325_v23 }
 0x647   :  { %v1328_v47 = vpack.c.bf16 %v1327_v24, %v1327_v24 }
 0x649   :  { %1486 = vmatmul.mubr.bf16.vlgmr.msra.gmra.mrb[32].mxu1 %v1328_v47  ;;  %2452 = vmatmul.mubr.bf16.vlgmr.msra.gmra.mrb[32].mxu0 %v1328_v47 }
 0x64a   :  { %1589 = vmatpush1.bf16.msra.mxu1 %v4094_v4  ;;  %1630 = vmatpush1.bf16.msra.mxu0 %v4095_v52  ;;  %v3648_v4 = vld [vmem:[#allocation6 + $0x9c] ss:$24 sps:$4 sm:$0xff]   ;;  %v3654_v52 = vld [vmem:[#allocation6 + $0xcc] ss:$24 sps:$4 sm:$0xff]  }
 0x64b   :  { %1590 = vmatprep.subr.bf16.mxu1 %v4096_v49  ;;  %1631 = vmatprep.subr.bf16.mxu0 %v3634_v38  ;;  %4135 = vst [vmem:[#allocation19_spill] sm:$0xff] %v3654_v52  ;;  %v4136_v49 = vld [vmem:[#allocation48_spill] sm:$0xff] }
 0x64c   :  { %1620 = vmatprep.mubr.bf16.mxu1 %v4042_v7  ;;  %1661 = vmatprep.mubr.bf16.mxu0 %v4042_v7 }
 0x64e   :  { %1591 = vmatpush1.bf16.msra.mxu1 %v4098_v18  ;;  %1632 = vmatpush1.bf16.msra.mxu0 %v4099_v30  ;;  %v4137_v18 = vld [vmem:[#allocation49_spill] sm:$0xff] }
 0x64f   :  { %1592 = vmatprep.subr.bf16.mxu1 %v4100_v36  ;;  %1633 = vmatprep.subr.bf16.mxu0 %v3642_v33  ;;  %v3660_v30 = vld [vmem:[#allocation6 + $0xfc] ss:$24 sps:$4 sm:$0xff]   ;;  %v4139_v36 = vld [vmem:[#allocation50_spill] sm:$0xff] }
 0x650   :  { %4138 = vst [vmem:[#allocation20_spill] sm:$0xff] %v3660_v30 }
 0x652   :  { %1593 = vmatpush1.bf16.msra.mxu1 %v4102_v37  ;;  %1634 = vmatpush1.bf16.msra.mxu0 %v4103_v44  ;;  %v4140_v37 = vld [vmem:[#allocation51_spill] sm:$0xff]  ;;  %v4141_v44 = vld [vmem:[#allocation52_spill] sm:$0xff] }
 0x653   :  { %1594 = vmatprep.subr.bf16.mxu1 %v4104_v54  ;;  %1635 = vmatprep.subr.bf16.mxu0 %v3648_v4  ;;  %v3666_v54 = vld [vmem:[#allocation6 + $0x12c] ss:$24 sps:$4 sm:$0xff]  }
 0x654   :  { %4142 = vst [vmem:[#allocation21_spill] sm:$0xff] %v3666_v54 }
 0x656   :  { %1595 = vmatpush1.bf16.msra.mxu1 %v4106_v35  ;;  %1636 = vmatpush1.bf16.msra.mxu0 %v4107_v6  ;;  %v4143_v35 = vld [vmem:[#allocation53_spill] sm:$0xff]  ;;  %v4144_v6 = vld [vmem:[#allocation54_spill] sm:$0xff] }
 0x657   :  { %1596 = vmatprep.subr.bf16.mxu1 %v4108_v16  ;;  %1637 = vmatprep.subr.bf16.mxu0 %v3654_v52  ;;  %v4145_v16 = vld [vmem:[#allocation55_spill] sm:$0xff] }
 0x65a   :  { %1597 = vmatpush1.bf16.msra.mxu1 %v4110_v19  ;;  %1638 = vmatpush1.bf16.msra.mxu0 %v4136_v49  ;;  %v3672_v19 = vld [vmem:[#allocation6 + $0x15c] ss:$24 sps:$4 sm:$0xff]  }
 0x65b   :  { %1598 = vmatprep.subr.bf16.mxu1 %v4137_v18  ;;  %1639 = vmatprep.subr.bf16.mxu0 %v3660_v30  ;;  %4146 = vst [vmem:[#allocation23_spill] sm:$0xff] %v3672_v19 }
 0x65e   :  { %1599 = vmatpush1.bf16.msra.mxu1 %v4139_v36  ;;  %1640 = vmatpush1.bf16.msra.mxu0 %v4140_v37 }
 0x65f   :  { %1600 = vmatprep.subr.bf16.mxu1 %v4141_v44  ;;  %1641 = vmatprep.subr.bf16.mxu0 %v3666_v54 }
 0x662   :  { %1601 = vmatpush1.bf16.msra.mxu1 %v4143_v35  ;;  %1642 = vmatpush1.bf16.msra.mxu0 %v4144_v6 }
 0x663   :  { %1602 = vmatprep.subr.bf16.mxu1 %v4145_v16  ;;  %1643 = vmatprep.subr.bf16.mxu0 %v3672_v19 }
 0x666   :  { %1603 = vmatpush1.bf16.msra.mxu1 %v4147_v27  ;;  %1644 = vmatpush1.bf16.msra.mxu0 %v4148_v41 }
 0x667   :  { %1670 = vmatprep.subr.bf16.mxu1 %v3677_v25  ;;  %1711 = vmatprep.subr.bf16.mxu0 %v4150_v28 }
 0x66e   :  { %v1364_v56 = vpop.f32.mrb[24].mxu0  ;;  %v1405_v20 = vpop.f32.mrb[28].mxu1 }
 0x66f   :  { %v1366_v22 = vpop.f32.mrb[25].mxu0  ;;  %v1407_v1 = vpop.f32.mrb[29].mxu1 }
 0x670   :  { %v1368_v23 = vpop.f32.mrb[26].mxu0  ;;  %v1409_v48 = vpop.f32.mrb[30].mxu1  ;;  %v1537_v54 = vadd.f32 %v1407_v1, %v3281_v55 }
 0x671   :  { %v1369_v24 = vpop.f32.mrb[27].mxu0  ;;  %v1410_v47 = vpop.f32.mrb[31].mxu1 }
 0x68e   :  { %v1446_v49 = vpop.f32.mrb[28].mxu0 }
 0x68f   :  { %v1448_v18 = vpop.f32.mrb[29].mxu0  ;;  %v1538_v47 = vadd.f32 %v1446_v49, %v4080_v61 }
 0x690   :  { %v1450_v36 = vpop.f32.mrb[30].mxu0  ;;  %v1539_v1 = vadd.f32 %v1448_v18, %v3293_v46 }
 0x691   :  { %v1451_v37 = vpop.f32.mrb[31].mxu0 }
 0x71c   :  { %v1487_v44 = vpop.f32.mrb[32].mxu1  ;;  %v1528_v35 = vpop.f32.mrb[32].mxu0 }
 0x71d   :  { %v1488_v6 = vadd.f32 %v1487_v44, %v1364_v56  ;;  %v1529_v16 = vadd.f32 %v1528_v35, %v1405_v20  ;;  %v1489_v27 = vpop.f32.mrb[33].mxu1  ;;  %v2453_v41 = vpop.f32.mrb[33].mxu0 }
 0x71e   :  { %v1490_v25 = vadd.f32 %v1489_v27, %v1366_v22  ;;  %v1491_v28 = vpop.f32.mrb[34].mxu1  ;;  %v1531_v19 = vpop.f32.mrb[34].mxu0 }
 0x71f   :  { %v1534_v23 = vadd.f32 %v1488_v6, %v4079_v21  ;;  %v1492_v48 = vpop.f32.mrb[35].mxu1  ;;  %v2454_v24 = vpop.f32.mrb[35].mxu0  ;;  %v1536_v35 = vadd.f32 %v1529_v16, %v3295_v58 }
 0x720   :  { %v1535_v36 = vadd.f32 %v1490_v25, %v4081_v15 }
 0x721   :  { %v1540_v37 = vadd.f32 %v1537_v54, %v1534_v23 }
 0x722   :  { %v1547_v30 = vadd.f32 %v1538_v47, %v1535_v36  ;;  %v3706_v47 = vld [vmem:[#allocation6 + $0x40] ss:$24 sps:$4 sm:$0xff]   ;;  %v3709_v36 = vld [vmem:[#allocation6 + $0x74] ss:$24 sps:$4 sm:$0xff]  }
 0x723   :  { %v2269_v52 = vmul.f32 -1.442695, %v1540_v37  ;;  %v3714_v37 = vld [vmem:[#allocation6 + $0x70] ss:$24 sps:$4 sm:$0xff]  }
 0x724   :  { %v2270_v56 = vmul.f32 -1.442695, %v1547_v30 }
 0x725   :  { %2688 = vpow2.f32 %v2269_v52 }
 0x726   :  { %2690 = vpow2.f32 %v2270_v56  ;;  %v3717_v56 = vld [vmem:[#allocation6 + $0xa4] ss:$24 sps:$4 sm:$0xff]  }
 0x72f   :  { %v2689_v20 = vpop.eup %2688 }
 0x730   :  { %v1544_v22 = vadd.f32 1.0, %v2689_v20  ;;  %v2691_v19 = vpop.eup %2690  ;;  %v3722_v20 = vld [vmem:[#allocation6 + $0xa0] ss:$24 sps:$4 sm:$0xff]  }
 0x731   :  { %v1551_v28 = vadd.f32 1.0, %v2691_v19  ;;  %v3730_v19 = vld [vmem:[#allocation6 + $0xd0] ss:$24 sps:$4 sm:$0xff]  }
 0x732   :  { %2692 = vrcp.f32 %v1544_v22  ;;  %v3725_v22 = vld [vmem:[#allocation6 + $0xd4] ss:$24 sps:$4 sm:$0xff]  }
 0x733   :  { %2694 = vrcp.f32 %v1551_v28  ;;  %v3733_v28 = vld [vmem:[#allocation6 + $0x104] ss:$24 sps:$4 sm:$0xff]  }
 0x73c   :  { %v2693_v44 = vpop.eup %2692 }
 0x73d   :  { %v1554_v6 = vmul.f32 %v2693_v44, %v1539_v1  ;;  %v2695_v54 = vpop.eup %2694  ;;  %v3738_v1 = vld [vmem:[#allocation6 + $0x100] ss:$24 sps:$4 sm:$0xff]   ;;  %v3741_v44 = vld [vmem:[#allocation6 + $0x134] ss:$24 sps:$4 sm:$0xff]  }
 0x73e   :  { %v1557_v25 = vsub.f32 1.0, %v2695_v54  ;;  %v1559_v30 = vmul.f32 %v2695_v54, %v3516_v17  ;;  %v3699_v17 = vld [vmem:[#allocation6 + $0x44] ss:$24 sps:$4 sm:$0xff]  }
 0x73f   :  { %v1555_v49 = vadd.f32 %v1554_v6, %v1536_v35  ;;  %v3746_v35 = vld [vmem:[#allocation6 + $0x130] ss:$24 sps:$4 sm:$0xff]   ;;  %v3749_v6 = vld [vmem:[#allocation6 + $0x164] ss:$24 sps:$4 sm:$0xff]  }
 0x740   :  { %v2771_v54 = vld [vmem:[#allocation6 + $0x4] ss:$24 sps:$4 sm:$0xff]  }
 0x741   :  { %2696 = vtanh.f32 %v1555_v49  ;;  %v3754_v49 = vld [vmem:[#allocation6 + $0x160] ss:$24 sps:$4 sm:$0xff]  }
 0x74b   :  { %v2697_v27 = vpop.eup %2696 }
 0x74c   :  { %v1558_v52 = vmul.f32 %v2697_v27, %v1557_v25 }
 0x74e   :  { %v3688_v41 = vadd.f32 %v1559_v30, %v1558_v52 }
 0x750   :  { %v1587_v23 = vpack.c.bf16 %v3688_v41, %v3688_v41  ;;  %v1561_v18 = vmul.f32 %v3688_v41, %v3688_v41  ;;  %v1569_v16 = vrot.slane %v3688_v41, %v3002_v5 }
 0x752   :  { %1621 = vmatmul.mubr.bf16.vlgmr.msra.gmra.mrb[36].mxu1 %v1587_v23  ;;  %1662 = vmatmul.mubr.bf16.vlgmr.msra.gmra.mrb[36].mxu0 %v1587_v23  ;;  %v1562_v48 = vsel %vm176_vm2, %v1561_v18, 0.0  ;;  %v1570_v24 = vmul.f32 %v3470_v0, %v1569_v16 }
 0x753   :  { %1671 = vmatpush1.bf16.msra.mxu1 %v3526_v50  ;;  %1563 = vadd.xlane.f32.xlu1 %v1562_v48 }
 0x754   :  { %1571 = vadd.xlane.f32.xlu0 %v1570_v24  ;;  %1672 = vmatprep.subr.bf16.mxu1 %v3699_v17 }
 0x755   :  { %1702 = vmatprep.mubr.bf16.mxu1 %v4042_v7  ;;  %1712 = vmatpush1.bf16.msra.mxu0 %v3531_v13 }
 0x756   :  { %1713 = vmatprep.subr.bf16.mxu0 %v3534_v29  ;;  %1743 = vmatprep.mubr.bf16.mxu0 %v4042_v7 }
 0x757   :  { %1673 = vmatpush1.bf16.msra.mxu1 %v3706_v47 }
 0x758   :  { %1674 = vmatprep.subr.bf16.mxu1 %v3709_v36 }
 0x759   :  { %1714 = vmatpush1.bf16.msra.mxu0 %v3540_v40 }
 0x75a   :  { %1715 = vmatprep.subr.bf16.mxu0 %v3543_v59 }
 0x75b   :  { %1675 = vmatpush1.bf16.msra.mxu1 %v3714_v37 }
 0x75c   :  { %1676 = vmatprep.subr.bf16.mxu1 %v3717_v56 }
 0x75d   :  { %1716 = vmatpush1.bf16.msra.mxu0 %v3548_v8 }
 0x75e   :  { %1717 = vmatprep.subr.bf16.mxu0 %v3551_v31 }
 0x75f   :  { %1677 = vmatpush1.bf16.msra.mxu1 %v3722_v20 }
 0x760   :  { %1678 = vmatprep.subr.bf16.mxu1 %v3725_v22 }
 0x761   :  { %1718 = vmatpush1.bf16.msra.mxu0 %v3556_v57 }
 0x762   :  { %1719 = vmatprep.subr.bf16.mxu0 %v3559_v62 }
 0x763   :  { %1679 = vmatpush1.bf16.msra.mxu1 %v3730_v19 }
 0x764   :  { %1680 = vmatprep.subr.bf16.mxu1 %v3733_v28 }
 0x765   :  { %1720 = vmatpush1.bf16.msra.mxu0 %v3564_v60 }
 0x766   :  { %1721 = vmatprep.subr.bf16.mxu0 %v3567_v2 }
 0x767   :  { %1681 = vmatpush1.bf16.msra.mxu1 %v3738_v1 }
 0x768   :  { %1682 = vmatprep.subr.bf16.mxu1 %v3741_v44 }
 0x769   :  { %1722 = vmatpush1.bf16.msra.mxu0 %v3572_v63 }
 0x76a   :  { %1723 = vmatprep.subr.bf16.mxu0 %v3575_v9 }
 0x76b   :  { %1683 = vmatpush1.bf16.msra.mxu1 %v3746_v35 }
 0x76c   :  { %1684 = vmatprep.subr.bf16.mxu1 %v3749_v6 }
 0x76d   :  { %1724 = vmatpush1.bf16.msra.mxu0 %v3580_v3 }
 0x76e   :  { %1725 = vmatprep.subr.bf16.mxu0 %v3583_v12 }
 0x76f   :  { %1685 = vmatpush1.bf16.msra.mxu1 %v3754_v49 }
 0x770   :  { %2455 = vmatprep.subr.bf16.mxu1 %v4043_v11 }
 0x771   :  { %1726 = vmatpush1.bf16.msra.mxu0 %v3588_v10 }
 0x772   :  { %1703 = vmatmul.mubr.bf16.vlgmr.msra.gmra.mrb[40].mxu1 %v1587_v23  ;;  %1846 = vmatprep.subr.bf16.mxu0 %v2771_v54 }
 0x773   :  { %2456 = vmatpush3.bf16.msra.mxu1 %v3592_v39  ;;  %2471 = vmatprep.mubr.msk.bf16.mxu1 %vm2901_vm3, %v4043_v11 }
 0x774   :  { %2457 = vmatprep.subr.bf16.mxu1 %v4043_v11 }
 0x777   :  { %2458 = vmatpush3.bf16.msra.mxu1 %v3598_v42 }
 0x778   :  { %2459 = vmatprep.subr.bf16.mxu1 %v4043_v11 }
 0x77b   :  { %2460 = vmatpush3.bf16.msra.mxu1 %v3602_v43 }
 0x77c   :  { %2461 = vmatprep.subr.bf16.mxu1 %v4043_v11 }
 0x77f   :  { %2462 = vmatpush3.bf16.msra.mxu1 %v3606_v45  ;;  %v2774_v45 = vld [vmem:[#allocation6 + $0x34] ss:$24 sps:$4 sm:$0xff]  }
 0x780   :  { %2463 = vmatprep.subr.bf16.mxu1 %v4043_v11 }
 0x783   :  { %2464 = vmatpush3.bf16.msra.mxu1 %v3610_v14 }
 0x784   :  { %2465 = vmatprep.subr.bf16.mxu1 %v4043_v11 }
 0x787   :  { %2466 = vmatpush3.bf16.msra.mxu1 %v3614_v32 }
 0x788   :  { %2467 = vmatprep.subr.bf16.mxu1 %v4043_v11 }
 0x78b   :  { %2468 = vmatpush3.bf16.msra.mxu1 %v3618_v26 }
 0x78c   :  { %2469 = vmatprep.subr.bf16.mxu1 %v4043_v11 }
 0x78f   :  { %2470 = vmatpush3.bf16.msra.mxu1 %v3622_v51 }
 0x790   :  { %1887 = vmatprep.subr.bf16.mxu1 %v3625_v53  ;;  %v2772_v53 = vld [vmem:[#allocation6] ss:$24 sps:$4 sm:$0xff]  }
 0x7e0   :  { %v1564_v25 = vpop.xlane.xlu1 %1563 }
 0x7e1   :  { %2698 = vrsqrt.f32 %v1564_v25  ;;  %v1572_v27 = vpop.xlane.xlu0 %1571  ;;  %v2773_v25 = vld [vmem:[#allocation6 + $0x8] ss:$24 sps:$4 sm:$0xff]  }
 0x7e2   :  { %v1573_v30 = vmul.f32 %v4093_v34, %v1572_v27  ;;  %v2775_v27 = vld [vmem:[#allocation6 + $0x30] ss:$24 sps:$4 sm:$0xff]  }
 0x7eb   :  { %v2699_v52 = vpop.eup %2698 }
 0x7ec   :  { %v1577_v23 = vrot.slane %v2699_v52, %v3002_v5  ;;  %v2776_v52 = vld [vmem:[#allocation6 + $0x38] ss:$24 sps:$4 sm:$0xff]  }
 0x7ee   :  { %v1578_v18 = vmul.f32 %v1577_v23, %v1573_v30  ;;  %v2783_v30 = vld [vmem:[#allocation6 + $0xc4] ss:$24 sps:$4 sm:$0xff]   ;;  %v4151_v23 = vld [vmem:[#allocation19_spill] sm:$0xff] }
 0x7f0   :  { %v1579_v16 = vmul.f32 %v3470_v0, %v1578_v18  ;;  %v2784_v18 = vld [vmem:[#allocation6 + $0xc0] ss:$24 sps:$4 sm:$0xff]  }
 0x7f2   :  { %v1580_v48 = vrot.slane %v1579_v16, 4 }
 0x7f4   :  { %v1581_v24 = vadd.f32 %v1580_v48, %v1579_v16  ;;  %v2785_v16 = vld [vmem:[#allocation6 + $0xc8] ss:$24 sps:$4 sm:$0xff]   ;;  %v4152_v48 = vld [vmem:[#allocation20_spill] sm:$0xff] }
 0x7f6   :  { %v1582_v54 = vrot.slane %v1581_v24, 2 }
 0x7f8   :  { %v1583_v26 = vadd.f32 %v1582_v54, %v1581_v24  ;;  %v2787_v24 = vld [vmem:[#allocation6 + $0xf0] ss:$24 sps:$4 sm:$0xff]  }
 0x7f9   :  { %v2788_v54 = vld [vmem:[#allocation6 + $0xf8] ss:$24 sps:$4 sm:$0xff]  }
 0x7fa   :  { %v1584_v32 = vrot.slane %v1583_v26, 1 }
 0x7fc   :  { %v1585_v14 = vadd.f32 %v1584_v32, %v1583_v26  ;;  %v2777_v32 = vld [vmem:[#allocation6 + $0x64] ss:$24 sps:$4 sm:$0xff]   ;;  %v2779_v26 = vld [vmem:[#allocation6 + $0x68] ss:$24 sps:$4 sm:$0xff]  }
 0x7fe   :  { %v1586_v51 = vpack.c.bf16 %v1585_v14, %v1585_v14  ;;  %v2778_v14 = vld [vmem:[#allocation6 + $0x60] ss:$24 sps:$4 sm:$0xff]  }
 0x800   :  { %1744 = vmatmul.mubr.bf16.vlgmr.msra.gmra.mrb[40].mxu0 %v1586_v51  ;;  %2472 = vmatmul.mubr.bf16.vlgmr.msra.gmra.mrb[44].mxu1 %v1586_v51  ;;  %v2780_v51 = vld [vmem:[#allocation6 + $0x94] ss:$24 sps:$4 sm:$0xff]  }
 0x801   :  { %1847 = vmatpush1.bf16.msra.mxu0 %v2772_v53  ;;  %1888 = vmatpush1.bf16.msra.mxu1 %v2773_v25  ;;  %v4153_v53 = vld [vmem:[#allocation21_spill] sm:$0xff] }
 0x802   :  { %1848 = vmatprep.subr.bf16.mxu0 %v2774_v45  ;;  %1889 = vmatprep.subr.bf16.mxu1 %v3634_v38  ;;  %v2781_v45 = vld [vmem:[#allocation6 + $0x90] ss:$24 sps:$4 sm:$0xff]   ;;  %v2790_v25 = vld [vmem:[#allocation6 + $0x120] ss:$24 sps:$4 sm:$0xff]  }
 0x803   :  { %1878 = vmatprep.mubr.bf16.mxu0 %v4042_v7  ;;  %1919 = vmatprep.mubr.bf16.mxu1 %v4042_v7  ;;  %v2782_v38 = vld [vmem:[#allocation6 + $0x98] ss:$24 sps:$4 sm:$0xff]  }
 0x805   :  { %1849 = vmatpush1.bf16.msra.mxu0 %v2775_v27  ;;  %1890 = vmatpush1.bf16.msra.mxu1 %v2776_v52  ;;  %v2791_v27 = vld [vmem:[#allocation6 + $0x128] ss:$24 sps:$4 sm:$0xff]   ;;  %v2792_v52 = vld [vmem:[#allocation6 + $0x154] ss:$24 sps:$4 sm:$0xff]  }
 0x806   :  { %1850 = vmatprep.subr.bf16.mxu0 %v2777_v32  ;;  %1891 = vmatprep.subr.bf16.mxu1 %v3642_v33  ;;  %v2786_v33 = vld [vmem:[#allocation6 + $0xf4] ss:$24 sps:$4 sm:$0xff]  }
 0x807   :  { %v4154_v32 = vld [vmem:[#allocation23_spill] sm:$0xff] }
 0x809   :  { %1851 = vmatpush1.bf16.msra.mxu0 %v2778_v14  ;;  %1892 = vmatpush1.bf16.msra.mxu1 %v2779_v26  ;;  %v2793_v14 = vld [vmem:[#allocation6 + $0x150] ss:$24 sps:$4 sm:$0xff]  }
 0x80a   :  { %1852 = vmatprep.subr.bf16.mxu0 %v2780_v51  ;;  %1893 = vmatprep.subr.bf16.mxu1 %v3648_v4  ;;  %v2789_v4 = vld [vmem:[#allocation6 + $0x124] ss:$24 sps:$4 sm:$0xff]   ;;  %v2794_v26 = vld [vmem:[#allocation6 + $0x158] ss:$24 sps:$4 sm:$0xff]  }
 0x80b   :  { %v4155_v51 = vld [vmem:[#allocation25_spill] sm:$0xff] }
 0x80d   :  { %1853 = vmatpush1.bf16.msra.mxu0 %v2781_v45  ;;  %1894 = vmatpush1.bf16.msra.mxu1 %v2782_v38  ;;  %v4156_v45 = vld [vmem:[#allocation14_spill] sm:$0xff] }
 0x80e   :  { %1854 = vmatprep.subr.bf16.mxu0 %v2783_v30  ;;  %1895 = vmatprep.subr.bf16.mxu1 %v4151_v23 }
 0x811   :  { %1855 = vmatpush1.bf16.msra.mxu0 %v2784_v18  ;;  %1896 = vmatpush1.bf16.msra.mxu1 %v2785_v16 }
 0x812   :  { %1856 = vmatprep.subr.bf16.mxu0 %v2786_v33  ;;  %1897 = vmatprep.subr.bf16.mxu1 %v4152_v48 }
 0x815   :  { %1857 = vmatpush1.bf16.msra.mxu0 %v2787_v24  ;;  %1898 = vmatpush1.bf16.msra.mxu1 %v2788_v54 }
 0x816   :  { %1858 = vmatprep.subr.bf16.mxu0 %v2789_v4  ;;  %1899 = vmatprep.subr.bf16.mxu1 %v4153_v53 }
 0x819   :  { %1859 = vmatpush1.bf16.msra.mxu0 %v2790_v25  ;;  %1900 = vmatpush1.bf16.msra.mxu1 %v2791_v27 }
 0x81a   :  { %1860 = vmatprep.subr.bf16.mxu0 %v2792_v52  ;;  %1901 = vmatprep.subr.bf16.mxu1 %v4154_v32 }
 0x81d   :  { %1861 = vmatpush1.bf16.msra.mxu0 %v2793_v14  ;;  %1902 = vmatpush1.bf16.msra.mxu1 %v2794_v26 }
 0x81e   :  { %1928 = vmatprep.subr.bf16.mxu0 %v4155_v51  ;;  %1969 = vmatprep.subr.bf16.mxu1 %v4156_v45 }
 0x825   :  { %v1622_v38 = vpop.f32.mrb[36].mxu1  ;;  %v1663_v30 = vpop.f32.mrb[36].mxu0 }
 0x826   :  { %v1624_v23 = vpop.f32.mrb[37].mxu1  ;;  %v1665_v18 = vpop.f32.mrb[37].mxu0 }
 0x827   :  { %v1626_v16 = vpop.f32.mrb[38].mxu1  ;;  %v1667_v33 = vpop.f32.mrb[38].mxu0  ;;  %v1795_v42 = vadd.f32 %v1665_v18, %v3281_v55 }
 0x828   :  { %v1627_v48 = vpop.f32.mrb[39].mxu1  ;;  %v1668_v24 = vpop.f32.mrb[39].mxu0 }
 0x845   :  { %v1704_v54 = vpop.f32.mrb[40].mxu1 }
 0x846   :  { %v1706_v4 = vpop.f32.mrb[41].mxu1  ;;  %v1796_v24 = vadd.f32 %v1704_v54, %v4080_v61 }
 0x847   :  { %v1708_v53 = vpop.f32.mrb[42].mxu1  ;;  %v1797_v18 = vadd.f32 %v1706_v4, %v3293_v46 }
 0x848   :  { %v1709_v25 = vpop.f32.mrb[43].mxu1 }
 0x8d3   :  { %v1745_v27 = vpop.f32.mrb[40].mxu0  ;;  %v1786_v52 = vpop.f32.mrb[44].mxu1 }
 0x8d4   :  { %v1746_v32 = vadd.f32 %v1745_v27, %v1622_v38  ;;  %v1787_v14 = vadd.f32 %v1786_v52, %v1663_v30  ;;  %v1747_v26 = vpop.f32.mrb[41].mxu0  ;;  %v2473_v51 = vpop.f32.mrb[45].mxu1 }
 0x8d5   :  { %v1748_v34 = vadd.f32 %v1747_v26, %v1624_v23  ;;  %v1749_v45 = vpop.f32.mrb[42].mxu0  ;;  %v1789_v43 = vpop.f32.mrb[46].mxu1 }
 0x8d6   :  { %v1792_v16 = vadd.f32 %v1746_v32, %v4079_v21  ;;  %v1750_v33 = vpop.f32.mrb[43].mxu0  ;;  %v2474_v48 = vpop.f32.mrb[47].mxu1  ;;  %v1794_v32 = vadd.f32 %v1787_v14, %v3295_v58 }
 0x8d7   :  { %v1793_v53 = vadd.f32 %v1748_v34, %v4081_v15 }
 0x8d8   :  { %v1798_v25 = vadd.f32 %v1795_v42, %v1792_v16 }
 0x8d9   :  { %v1805_v39 = vadd.f32 %v1796_v24, %v1793_v53 }
 0x8da   :  { %v2271_v10 = vmul.f32 -1.442695, %v1798_v25 }
 0x8db   :  { %v2272_v38 = vmul.f32 -1.442695, %v1805_v39 }
 0x8dc   :  { %2700 = vpow2.f32 %v2271_v10 }
 0x8dd   :  { %2702 = vpow2.f32 %v2272_v38  ;;  %v2640_v38 = vld [vmem:[#allocation8] sm:$0xff]  }
 0x8e6   :  { %v2701_v30 = vpop.eup %2700 }
 0x8e7   :  { %v1802_v23 = vadd.f32 1.0, %v2701_v30  ;;  %v2703_v43 = vpop.eup %2702  ;;  %v2641_v30 = vld [vmem:[#allocation8 + $0x8] sm:$0xff]  }
 0x8e8   :  { %v1809_v27 = vadd.f32 1.0, %v2703_v43  ;;  %v2643_v43 = vld [vmem:[#allocation8 + $0x18] sm:$0xff]  }
 0x8e9   :  { %2704 = vrcp.f32 %v1802_v23  ;;  %v2642_v23 = vld [vmem:[#allocation8 + $0x10] sm:$0xff]  }
 0x8ea   :  { %2706 = vrcp.f32 %v1809_v27  ;;  %v2644_v27 = vld [vmem:[#allocation8 + $0x20] sm:$0xff]  }
 0x8f3   :  { %v2705_v52 = vpop.eup %2704 }
 0x8f4   :  { %v1812_v26 = vmul.f32 %v2705_v52, %v1797_v18  ;;  %v2707_v34 = vpop.eup %2706  ;;  %v2645_v18 = vld [vmem:[#allocation8 + $0x28] sm:$0xff]   ;;  %v2646_v52 = vld [vmem:[#allocation8 + $0x30] sm:$0xff]  }
 0x8f5   :  { %v1815_v42 = vsub.f32 1.0, %v2707_v34  ;;  %v1817_v39 = vmul.f32 %v2707_v34, %v3688_v41 }
 0x8f6   :  { %v1813_v54 = vadd.f32 %v1812_v26, %v1794_v32  ;;  %v2647_v32 = vld [vmem:[#allocation8 + $0x38] sm:$0xff]  }
 0x8f8   :  { %2708 = vtanh.f32 %v1813_v54 }
 0x902   :  { %v2709_v51 = vpop.eup %2708 }
 0x903   :  { %v1816_v10 = vmul.f32 %v2709_v51, %v1815_v42 }
 0x905   :  { %v3798_v45 = vadd.f32 %v1817_v39, %v1816_v10 }
 0x907   :  { %v1845_v16 = vpack.c.bf16 %v3798_v45, %v3798_v45  ;;  %v1819_v4 = vmul.f32 %v3798_v45, %v3798_v45  ;;  %v1827_v14 = vrot.slane %v3798_v45, %v3002_v5 }
 0x909   :  { %1879 = vmatmul.mubr.bf16.vlgmr.msra.gmra.mrb[44].mxu0 %v1845_v16  ;;  %1920 = vmatmul.mubr.bf16.vlgmr.msra.gmra.mrb[48].mxu1 %v1845_v16  ;;  %v1820_v33 = vsel %vm176_vm2, %v1819_v4, 0.0  ;;  %v1828_v48 = vmul.f32 %v3470_v0, %v1827_v14 }
 0x90a   :  { %1929 = vmatpush1.bf16.msra.mxu0 %v3526_v50  ;;  %1821 = vadd.xlane.f32.xlu1 %v1820_v33  ;;  %v4158_v50 = vld [vmem:[#allocation60_spill] sm:$0xff] }
 0x90b   :  { %1829 = vadd.xlane.f32.xlu0 %v1828_v48  ;;  %1930 = vmatprep.subr.bf16.mxu0 %v3699_v17 }
 0x90c   :  { %1960 = vmatprep.mubr.bf16.mxu0 %v4042_v7  ;;  %1970 = vmatpush1.bf16.msra.mxu1 %v3531_v13  ;;  %v4159_v13 = vld [vmem:[#allocation59_spill] sm:$0xff] }
 0x90d   :  { %1971 = vmatprep.subr.bf16.mxu1 %v3534_v29  ;;  %2001 = vmatprep.mubr.bf16.mxu1 %v4042_v7  ;;  %v4157_v7 = vld [vmem:[#allocation58_spill] sm:$0xff] }
 0x90e   :  { %1931 = vmatpush1.bf16.msra.mxu0 %v3706_v47  ;;  %v4160_v29 = vld [vmem:[#allocation22_spill] sm:$0xff] }
 0x90f   :  { %1932 = vmatprep.subr.bf16.mxu0 %v3709_v36 }
 0x910   :  { %1972 = vmatpush1.bf16.msra.mxu1 %v3540_v40  ;;  %v4161_v40 = vld [vmem:[#allocation34_spill] sm:$0xff] }
 0x911   :  { %1973 = vmatprep.subr.bf16.mxu1 %v3543_v59  ;;  %v4162_v59 = vld [vmem:[#allocation15_spill] sm:$0xff] }
 0x912   :  { %1933 = vmatpush1.bf16.msra.mxu0 %v3714_v37 }
 0x913   :  { %1934 = vmatprep.subr.bf16.mxu0 %v3717_v56 }
 0x914   :  { %1974 = vmatpush1.bf16.msra.mxu1 %v3548_v8  ;;  %v4163_v8 = vld [vmem:[#allocation16_spill] sm:$0xff] }
 0x915   :  { %1975 = vmatprep.subr.bf16.mxu1 %v3551_v31  ;;  %v4164_v31 = vld [vmem:[#allocation17_spill] sm:$0xff] }
 0x916   :  { %1935 = vmatpush1.bf16.msra.mxu0 %v3722_v20 }
 0x917   :  { %1936 = vmatprep.subr.bf16.mxu0 %v3725_v22 }
 0x918   :  { %1976 = vmatpush1.bf16.msra.mxu1 %v3556_v57  ;;  %v4165_v57 = vld [vmem:[#allocation18_spill] sm:$0xff] }
 0x919   :  { %1977 = vmatprep.subr.bf16.mxu1 %v3559_v62 }
 0x91a   :  { %1937 = vmatpush1.bf16.msra.mxu0 %v3730_v19 }
 0x91b   :  { %1938 = vmatprep.subr.bf16.mxu0 %v3733_v28 }
 0x91c   :  { %1978 = vmatpush1.bf16.msra.mxu1 %v3564_v60 }
 0x91d   :  { %1979 = vmatprep.subr.bf16.mxu1 %v3567_v2 }
 0x91e   :  { %1939 = vmatpush1.bf16.msra.mxu0 %v3738_v1 }
 0x91f   :  { %1940 = vmatprep.subr.bf16.mxu0 %v3741_v44 }
 0x920   :  { %1980 = vmatpush1.bf16.msra.mxu1 %v3572_v63  ;;  %v4166_v63 = vld [vmem:[#allocation24_spill] sm:$0xff] }
 0x921   :  { %1981 = vmatprep.subr.bf16.mxu1 %v3575_v9 }
 0x922   :  { %1941 = vmatpush1.bf16.msra.mxu0 %v3746_v35 }
 0x923   :  { %1942 = vmatprep.subr.bf16.mxu0 %v3749_v6 }
 0x924   :  { %1982 = vmatpush1.bf16.msra.mxu1 %v3580_v3 }
 0x925   :  { %1983 = vmatprep.subr.bf16.mxu1 %v3583_v12 }
 0x926   :  { %1943 = vmatpush1.bf16.msra.mxu0 %v3754_v49 }
 0x927   :  { %2475 = vmatprep.subr.bf16.mxu0 %v4043_v11 }
 0x928   :  { %1984 = vmatpush1.bf16.msra.mxu1 %v4157_v7 }
 0x929   :  { %1961 = vmatmul.mubr.bf16.vlgmr.msra.gmra.mrb[48].mxu0 %v1845_v16  ;;  %2495 = vmatprep.subr.bf16.mxu1 %v4043_v11 }
 0x92a   :  { %2476 = vmatpush3.bf16.msra.mxu0 %v4158_v50  ;;  %2491 = vmatprep.mubr.msk.bf16.mxu0 %vm2901_vm3, %v4043_v11 }
 0x92b   :  { %2477 = vmatprep.subr.bf16.mxu0 %v4043_v11 }
 0x92e   :  { %2478 = vmatpush3.bf16.msra.mxu0 %v4159_v13 }
 0x92f   :  { %2479 = vmatprep.subr.bf16.mxu0 %v4043_v11 }
 0x932   :  { %2480 = vmatpush3.bf16.msra.mxu0 %v4160_v29 }
 0x933   :  { %2481 = vmatprep.subr.bf16.mxu0 %v4043_v11 }
 0x936   :  { %2482 = vmatpush3.bf16.msra.mxu0 %v4161_v40 }
 0x937   :  { %2483 = vmatprep.subr.bf16.mxu0 %v4043_v11 }
 0x93a   :  { %2484 = vmatpush3.bf16.msra.mxu0 %v4162_v59 }
 0x93b   :  { %2485 = vmatprep.subr.bf16.mxu0 %v4043_v11 }
 0x93e   :  { %2486 = vmatpush3.bf16.msra.mxu0 %v4163_v8 }
 0x93f   :  { %2487 = vmatprep.subr.bf16.mxu0 %v4043_v11 }
 0x942   :  { %2488 = vmatpush3.bf16.msra.mxu0 %v4164_v31 }
 0x943   :  { %2489 = vmatprep.subr.bf16.mxu0 %v4043_v11 }
 0x946   :  { %2490 = vmatpush3.bf16.msra.mxu0 %v4165_v57 }
 0x997   :  { %v1822_v62 = vpop.xlane.xlu1 %1821 }
 0x998   :  { %2710 = vrsqrt.f32 %v1822_v62  ;;  %v1830_v60 = vpop.xlane.xlu0 %1829 }
 0x999   :  { %v1831_v9 = vmul.f32 %v4166_v63, %v1830_v60 }
 0x9a2   :  { %v2711_v2 = vpop.eup %2710 }
 0x9a3   :  { %v1835_v3 = vrot.slane %v2711_v2, %v3002_v5 }
 0x9a5   :  { %v1836_v12 = vmul.f32 %v1835_v3, %v1831_v9 }
 0x9a7   :  { %v1837_v41 = vmul.f32 %v3470_v0, %v1836_v12 }
 0x9a9   :  { %v1838_v17 = vrot.slane %v1837_v41, 4 }
 0x9ab   :  { %v1839_v47 = vadd.f32 %v1838_v17, %v1837_v41 }
 0x9ad   :  { %v1840_v36 = vrot.slane %v1839_v47, 2 }
 0x9af   :  { %v1841_v37 = vadd.f32 %v1840_v36, %v1839_v47  ;;  %v2094_v47 = vld [vmem:[#allocation9] sm:$0x1] }
 0x9b1   :  { %v1842_v56 = vrot.slane %v1841_v37, 1 }
 0x9b3   :  { %v1843_v20 = vadd.f32 %v1842_v56, %v1841_v37 }
 0x9b5   :  { %v1844_v22 = vpack.c.bf16 %v1843_v20, %v1843_v20 }
 0x9b7   :  { %2002 = vmatmul.mubr.bf16.vlgmr.msra.gmra.mrb[52].mxu1 %v1844_v22  ;;  %2492 = vmatmul.mubr.bf16.vlgmr.msra.gmra.mrb[52].mxu0 %v1844_v22 }
 0x9b8   :  { %2511 = vmatprep.mubr.msk.bf16.mxu1 %vm2901_vm3, %v4043_v11  ;;  %2496 = vmatpush3.bf16.msra.mxu1 %v2640_v38 }
 0x9b9   :  { %2497 = vmatprep.subr.bf16.mxu1 %v4043_v11 }
 0x9bc   :  { %2498 = vmatpush3.bf16.msra.mxu1 %v2641_v30 }
 0x9bd   :  { %2499 = vmatprep.subr.bf16.mxu1 %v4043_v11 }
 0x9c0   :  { %2500 = vmatpush3.bf16.msra.mxu1 %v2642_v23 }
 0x9c1   :  { %2501 = vmatprep.subr.bf16.mxu1 %v4043_v11 }
 0x9c4   :  { %2502 = vmatpush3.bf16.msra.mxu1 %v2643_v43 }
 0x9c5   :  { %2503 = vmatprep.subr.bf16.mxu1 %v4043_v11 }
 0x9c8   :  { %2504 = vmatpush3.bf16.msra.mxu1 %v2644_v27 }
 0x9c9   :  { %2505 = vmatprep.subr.bf16.mxu1 %v4043_v11 }
 0x9cc   :  { %2506 = vmatpush3.bf16.msra.mxu1 %v2645_v18 }
 0x9cd   :  { %2507 = vmatprep.subr.bf16.mxu1 %v4043_v11 }
 0x9d0   :  { %2508 = vmatpush3.bf16.msra.mxu1 %v2646_v52 }
 0x9d1   :  { %2509 = vmatprep.subr.bf16.mxu1 %v4043_v11 }
 0x9d4   :  { %2510 = vmatpush3.bf16.msra.mxu1 %v2647_v32 }
 0x9dc   :  { %v1880_v19 = vpop.f32.mrb[44].mxu0  ;;  %v1921_v28 = vpop.f32.mrb[48].mxu1 }
 0x9dd   :  { %v1882_v1 = vpop.f32.mrb[45].mxu0  ;;  %v1923_v44 = vpop.f32.mrb[49].mxu1 }
 0x9de   :  { %v1884_v5 = vpop.f32.mrb[46].mxu0  ;;  %v1925_v35 = vpop.f32.mrb[50].mxu1  ;;  %v2053_v14 = vadd.f32 %v1923_v44, %v3281_v55 }
 0x9df   :  { %v1885_v6 = vpop.f32.mrb[47].mxu0  ;;  %v1926_v0 = vpop.f32.mrb[51].mxu1 }
 0x9fc   :  { %v1962_v49 = vpop.f32.mrb[48].mxu0 }
 0x9fd   :  { %v1964_v24 = vpop.f32.mrb[49].mxu0  ;;  %v2054_v50 = vadd.f32 %v1962_v49, %v4080_v61 }
 0x9fe   :  { %v1966_v53 = vpop.f32.mrb[50].mxu0  ;;  %v2055_v55 = vadd.f32 %v1964_v24, %v3293_v46 }
 0x9ff   :  { %v1967_v25 = vpop.f32.mrb[51].mxu0 }
 0xa8a   :  { %v2003_v26 = vpop.f32.mrb[52].mxu1  ;;  %v2044_v54 = vpop.f32.mrb[52].mxu0 }
 0xa8b   :  { %v2004_v34 = vadd.f32 %v2003_v26, %v1880_v19  ;;  %v2045_v42 = vadd.f32 %v2044_v54, %v1921_v28  ;;  %v2005_v51 = vpop.f32.mrb[53].mxu1  ;;  %v2493_v10 = vpop.f32.mrb[53].mxu0 }
 0xa8c   :  { %v2006_v39 = vadd.f32 %v2005_v51, %v1882_v1  ;;  %v2007_v16 = vpop.f32.mrb[54].mxu1  ;;  %v2047_v4 = vpop.f32.mrb[54].mxu0 }
 0xa8d   :  { %v2050_v33 = vadd.f32 %v2004_v34, %v4079_v21  ;;  %v2008_v48 = vpop.f32.mrb[55].mxu1  ;;  %v2494_v7 = vpop.f32.mrb[55].mxu0  ;;  %v2052_v60 = vadd.f32 %v2045_v42, %v3295_v58 }
 0xa8e   :  { %v2051_v11 = vadd.f32 %v2006_v39, %v4081_v15 }
 0xa8f   :  { %v2056_v13 = vadd.f32 %v2053_v14, %v2050_v33 }
 0xa90   :  { %v2063_v29 = vadd.f32 %v2054_v50, %v2051_v11 }
 0xa91   :  { %v2273_v40 = vmul.f32 -1.442695, %v2056_v13 }
 0xa92   :  { %v2274_v59 = vmul.f32 -1.442695, %v2063_v29 }
 0xa93   :  { %2712 = vpow2.f32 %v2273_v40 }
 0xa94   :  { %2714 = vpow2.f32 %v2274_v59 }
 0xa9d   :  { %v2713_v8 = vpop.eup %2712 }
 0xa9e   :  { %v2060_v31 = vadd.f32 1.0, %v2713_v8  ;;  %v2715_v57 = vpop.eup %2714 }
 0xa9f   :  { %v2067_v62 = vadd.f32 1.0, %v2715_v57 }
 0xaa0   :  { %2716 = vrcp.f32 %v2060_v31 }
 0xaa1   :  { %2718 = vrcp.f32 %v2067_v62 }
 0xaaa   :  { %v2717_v21 = vpop.eup %2716 }
 0xaab   :  { %v2070_v2 = vmul.f32 %v2717_v21, %v2055_v55  ;;  %v2719_v15 = vpop.eup %2718 }
 0xaac   :  { %v2073_v63 = vsub.f32 1.0, %v2719_v15  ;;  %v2075_v12 = vmul.f32 %v2719_v15, %v3798_v45 }
 0xaad   :  { %v2071_v61 = vadd.f32 %v2070_v2, %v2052_v60 }
 0xaaf   :  { %2720 = vtanh.f32 %v2071_v61 }
 0xab9   :  { %v2721_v9 = vpop.eup %2720 }
 0xaba   :  { %v2074_v3 = vmul.f32 %v2721_v9, %v2073_v63 }
 0xabc   :  { %v2076_v41 = vadd.f32 %v2075_v12, %v2074_v3 }
 0xabe   :  { %v2077_v17 = vpack.c.bf16 %v2076_v41, %v2076_v41 }
 0xac0   :  { %2512 = vmatmul.mubr.bf16.vlgmr.msra.gmra.mrb[56].mxu1 %v2077_v17 }
 0xb93   :  { %v2177_v36 = vpop.f32.mrb[56].mxu1 }
 0xb94   :  { %v2178_v37 = vadd.f32 %v2177_v36, %v2094_v47  ;;  %v2513_v46 = vpop.f32.mrb[57].mxu1 }
 0xb95   :  { %v2180_v56 = vpop.f32.mrb[58].mxu1 }
 0xb96   :  { %2183 = vst [vmem:[%s3888_s7] sm:$0x1] %v2178_v37  ;;  %v2514_v58 = vpop.f32.mrb[59].mxu1 }
 0xb97   :  { %2188 = vsyncpa [#allocation5], 1 }
 0xb98   :  { %2189 = vsyncpa [#allocation7], 1 }
 0xb99   :  { %2190 = vsyncpa [#allocation10], 1 }

</bundles_post_ra>
